<compile_context>
chip_gen: v7x
topology: tpu7x:2x2x1
jax: 0.10.0
libtpu: 0.0.40
codegen_flags: <defaults>
</compile_context>

<pallas_src>
import jax
import jax.numpy as jnp
from jax.experimental import pallas as pl
from jax.experimental.pallas import tpu as pltpu

HID = 256


def _prelu(x, slope):
    return jnp.where(x >= 0.0, x, slope * x)


def critic_kernel(state_ref, action_ref, w1s_ref, w1a_ref, wh_ref,
                  meta_ref, w5p_ref, out_ref):
    """Twin-Q forward for one batch tile.

    state_ref : (TB, S) f32        action_ref : (TB, A) f32
    w1s_ref   : (S, 2*HID) bf16    w1a_ref    : (A, 2*HID) bf16
        layer-1 weights of both branches fused along the output dim
    wh_ref    : (6, HID, HID) bf16   row = hidden_layer*2 + branch (layers 2-4)
    meta_ref  : (17, HID) f32
        rows 0..7  : biases,  row = layer*2 + branch  (layers 1-4)
        rows 8..15 : PReLU slopes, same indexing
        row 16     : [b5_branch1, b5_branch2, 0, ...]
    w5p_ref   : (2, HID, 2) bf16   per-branch final weights, off-branch
                                   column zeroed (block-diagonal 512x2)
    out_ref   : (TB, 2) f32        [:, 0] = q1, [:, 1] = q2
    """
    meta = meta_ref[...]

    # ---- Layer 1: one fused (TB, S+A) x (S+A, 512) matmul on the MXU -------
    s16 = state_ref[...].astype(jnp.bfloat16)
    a16 = action_ref[...].astype(jnp.bfloat16)
    h0 = (jnp.dot(s16, w1s_ref[...], preferred_element_type=jnp.float32)
          + jnp.dot(a16, w1a_ref[...], preferred_element_type=jnp.float32))

    h = [
        _prelu(h0[:, :HID] + meta[0:1], meta[8:9]),    # branch 1
        _prelu(h0[:, HID:] + meta[1:2], meta[9:10]),   # branch 2
    ]

    # ---- Layers 2..4, interleaved across the two branches -------------------
    for li in range(3):
        nxt = []
        for br in range(2):
            row = 2 + 2 * li + br
            w = wh_ref[2 * li + br]                    # (HID, HID) bf16
            z = (jnp.dot(h[br].astype(jnp.bfloat16), w,
                         preferred_element_type=jnp.float32)
                 + meta[row:row + 1])
            nxt.append(_prelu(z, meta[8 + row:9 + row]))
        h = nxt

    # ---- Epilogue: block-diagonal 512->2 matmul, single store ---------------
    q = (jnp.dot(h[0].astype(jnp.bfloat16), w5p_ref[0],
                 preferred_element_type=jnp.float32)
         + jnp.dot(h[1].astype(jnp.bfloat16), w5p_ref[1],
                   preferred_element_type=jnp.float32))
    out_ref[...] = q + meta[16:17, 0:2]


def _pick_tb(B):
    """Batch-tile size.

    * B <= 128: one tile (latency / weight-DMA-bound regime; don't split).
    * Larger B: fat tiles to fill the 256-wide MXU M dim (v6e/v7x) and
      amortize the ~0.35 us per-grid-step overhead, while keeping >= 2 grid
      steps so the "parallel" grid axis shards across v7x's two TensorCores.
    """
    if B <= 128:
        return B
    if B <= 256:
        return 128
    if B <= 2048:
        return 256
    return 512


@jax.jit
def critic_forward(state, action, params):
    """params: (w1s, w1a, wh, meta, w5p) — see init_params."""
    w1s, w1a, wh, meta, w5p = params
    B, S = state.shape
    A = action.shape[1]
    TB = _pick_tb(B)
    grid = (pl.cdiv(B, TB),)

    def resident(shape):                   # weights: same block every grid step
        nd = len(shape)
        return pl.BlockSpec(shape, lambda i, _nd=nd: (0,) * _nd)

    q = pl.pallas_call(
        critic_kernel,
        out_shape=jax.ShapeDtypeStruct((B, 2), jnp.float32),
        grid=grid,
        in_specs=[
            pl.BlockSpec((TB, S), lambda i: (i, 0)),
            pl.BlockSpec((TB, A), lambda i: (i, 0)),
            resident(w1s.shape), resident(w1a.shape), resident(wh.shape),
            resident(meta.shape), resident(w5p.shape),
        ],
        out_specs=pl.BlockSpec((TB, 2), lambda i: (i, 0)),
        compiler_params=pltpu.CompilerParams(
            dimension_semantics=("parallel",)),   # megacore sharding on v7x
    )(state, action, w1s, w1a, wh, meta, w5p)
    return q[:, 0:1], q[:, 1:2]


def init_params(key, state_dim, action_dim):
    """nn.Linear-style init (U(-1/sqrt(fan_in), 1/sqrt(fan_in))) plus
    torch.randn-style PReLU slopes, packed into 5 kernel-friendly tensors."""
    keys = iter(jax.random.split(key, 28))

    def linear(din, dout):
        bound = 1.0 / (din ** 0.5)
        w = jax.random.uniform(next(keys), (din, dout), jnp.float32, -bound, bound)
        b = jax.random.uniform(next(keys), (dout,), jnp.float32, -bound, bound)
        return w, b

    branches = []
    for _ in range(2):
        w1, b1 = linear(state_dim + action_dim, HID)
        hidden = [linear(HID, HID) for _ in range(3)]
        w5, b5 = linear(HID, 1)
        slopes = [jax.random.normal(next(keys), (HID,), jnp.float32)
                  for _ in range(4)]
        branches.append(dict(w1=w1, b1=b1, hidden=hidden, w5=w5, b5=b5,
                             slopes=slopes))

    S = state_dim
    # Layer-1 weights of both branches fused along the output dim, split into
    # state / action row blocks (removes the wrapper-side concatenate).
    w1_fused = jnp.concatenate([branches[0]["w1"], branches[1]["w1"]], axis=1)
    w1s = w1_fused[:S].astype(jnp.bfloat16)               # (S, 512)
    w1a = w1_fused[S:].astype(jnp.bfloat16)               # (A, 512)

    # Hidden-layer weights, row index = hidden_layer*2 + branch.
    wh = jnp.stack([branches[br]["hidden"][li][0]
                    for li in range(3) for br in range(2)],
                   axis=0).astype(jnp.bfloat16)            # (6, 256, 256)

    def layer_bias(br, li):
        return branches[br]["b1"] if li == 0 else branches[br]["hidden"][li - 1][1]

    bias = jnp.stack([layer_bias(br, li)
                      for li in range(4) for br in range(2)], axis=0)    # (8, 256)
    slope = jnp.stack([branches[br]["slopes"][li]
                       for li in range(4) for br in range(2)], axis=0)   # (8, 256)

    meta = jnp.zeros((17, HID), jnp.float32)
    meta = meta.at[0:8].set(bias)
    meta = meta.at[8:16].set(slope)
    meta = meta.at[16, 0].set(branches[0]["b5"][0])
    meta = meta.at[16, 1].set(branches[1]["b5"][0])

    # Block-diagonal final weights: w5p[0][:,0]=w5_branch1, w5p[1][:,1]=w5_branch2.
    w5p = jnp.zeros((2, HID, 2), jnp.float32)
    w5p = w5p.at[0, :, 0].set(branches[0]["w5"][:, 0])
    w5p = w5p.at[1, :, 1].set(branches[1]["w5"][:, 0])
    w5p = w5p.astype(jnp.bfloat16)

    return (w1s, w1a, wh, meta, w5p)


def reference_forward(state, action, params):
    """Pure-JAX reference doing the exact same arithmetic as the kernel."""
    w1s, w1a, wh, meta, w5p = params
    h0 = (jnp.dot(state.astype(jnp.bfloat16), w1s,
                  preferred_element_type=jnp.float32)
          + jnp.dot(action.astype(jnp.bfloat16), w1a,
                    preferred_element_type=jnp.float32))
    h = [_prelu(h0[:, :HID] + meta[0:1], meta[8:9]),
         _prelu(h0[:, HID:] + meta[1:2], meta[9:10])]
    for li in range(3):
        nxt = []
        for br in range(2):
            row = 2 + 2 * li + br
            z = (jnp.dot(h[br].astype(jnp.bfloat16), wh[2 * li + br],
                         preferred_element_type=jnp.float32)
                 + meta[row:row + 1])
            nxt.append(_prelu(z, meta[8 + row:9 + row]))
        h = nxt
    q = (jnp.dot(h[0].astype(jnp.bfloat16), w5p[0],
                 preferred_element_type=jnp.float32)
         + jnp.dot(h[1].astype(jnp.bfloat16), w5p[1],
                   preferred_element_type=jnp.float32))
    q = q + meta[16:17, 0:2]
    return q[:, 0:1], q[:, 1:2]


if __name__ == "__main__":
    # Small, TPU-friendly example shapes.
    B, STATE_DIM, ACTION_DIM = 8, 16, 8

    key = jax.random.PRNGKey(0)
    k_state, k_action, k_params, k_big = jax.random.split(key, 4)

    state = jax.random.normal(k_state, (B, STATE_DIM), jnp.float32)
    action = jax.random.normal(k_action, (B, ACTION_DIM), jnp.float32)
    params = init_params(k_params, STATE_DIM, ACTION_DIM)

    q1, q2 = critic_forward(state, action, params)
    jax.block_until_ready((q1, q2))

    r1, r2 = reference_forward(state, action, params)
    assert q1.shape == (B, 1) and q2.shape == (B, 1)
    assert jnp.allclose(q1, r1, atol=1e-3, rtol=1e-3)
    assert jnp.allclose(q2, r2, atol=1e-3, rtol=1e-3)

    # Also exercise the multi-tile (grid > 1, megacore-parallel) path.
    B2 = 256
    kb_s, kb_a = jax.random.split(k_big)
    state2 = jax.random.normal(kb_s, (B2, STATE_DIM), jnp.float32)
    action2 = jax.random.normal(kb_a, (B2, ACTION_DIM), jnp.float32)
    q1b, q2b = critic_forward(state2, action2, params)
    jax.block_until_ready((q1b, q2b))
    r1b, r2b = reference_forward(state2, action2, params)
    assert q1b.shape == (B2, 1) and q2b.shape == (B2, 1)
    assert jnp.allclose(q1b, r1b, atol=1e-3, rtol=1e-3)
    assert jnp.allclose(q2b, r2b, atol=1e-3, rtol=1e-3)

    print("KERNEL_OK")
</pallas_src>

<mosaic_0001>
module attributes {stable_mosaic.version = 11 : i64} {
  func.func @critic_kernel(%arg0: i32, %arg1: memref<8x16xf32, #tpu.memory_space<vmem>>, %arg2: memref<8x8xf32, #tpu.memory_space<vmem>>, %arg3: memref<16x512xbf16, #tpu.memory_space<vmem>>, %arg4: memref<8x512xbf16, #tpu.memory_space<vmem>>, %arg5: memref<6x256x256xbf16, #tpu.memory_space<vmem>>, %arg6: memref<17x256xf32, #tpu.memory_space<vmem>>, %arg7: memref<2x256x2xbf16, #tpu.memory_space<vmem>>, %arg8: memref<8x2xf32, #tpu.memory_space<vmem>>) attributes {dimension_semantics = [#tpu.dimension_semantics<parallel>], iteration_bounds = array<i64: 1>, scalar_prefetch = 0 : i64, scratch_operands = 0 : i64, tpu.core_type = #tpu.core_type<tc>, window_params = [{transform_indices = @transform_0, window_bounds = array<i64: 8, 16>}, {transform_indices = @transform_1, window_bounds = array<i64: 8, 8>}, {pipeline_mode = #tpu.pipeline_mode<synchronous>, transform_indices = @transform_2, window_bounds = array<i64: 16, 512>}, {pipeline_mode = #tpu.pipeline_mode<synchronous>, transform_indices = @transform_3, window_bounds = array<i64: 8, 512>}, {pipeline_mode = #tpu.pipeline_mode<synchronous>, transform_indices = @transform_4, window_bounds = array<i64: 6, 256, 256>}, {pipeline_mode = #tpu.pipeline_mode<synchronous>, transform_indices = @transform_5, window_bounds = array<i64: 17, 256>}, {pipeline_mode = #tpu.pipeline_mode<synchronous>, transform_indices = @transform_6, window_bounds = array<i64: 2, 256, 2>}, {transform_indices = @transform_7, window_bounds = array<i64: 8, 2>}]} {
    %c0 = arith.constant 0 : index
    %c0_0 = arith.constant 0 : index
    %0 = vector.load %arg6[%c0, %c0_0] : memref<17x256xf32, #tpu.memory_space<vmem>>, vector<17x256xf32>
    %c0_1 = arith.constant 0 : index
    %c0_2 = arith.constant 0 : index
    %1 = vector.load %arg1[%c0_1, %c0_2] : memref<8x16xf32, #tpu.memory_space<vmem>>, vector<8x16xf32>
    %2 = arith.truncf %1 : vector<8x16xf32> to vector<8x16xbf16>
    %c0_3 = arith.constant 0 : index
    %c0_4 = arith.constant 0 : index
    %3 = vector.load %arg2[%c0_3, %c0_4] : memref<8x8xf32, #tpu.memory_space<vmem>>, vector<8x8xf32>
    %4 = arith.truncf %3 : vector<8x8xf32> to vector<8x8xbf16>
    %c0_5 = arith.constant 0 : index
    %c0_6 = arith.constant 0 : index
    %5 = vector.load %arg3[%c0_5, %c0_6] : memref<16x512xbf16, #tpu.memory_space<vmem>>, vector<16x512xbf16>
    %cst = arith.constant dense<0.000000e+00> : vector<8x512xf32>
    %6 = tpu.matmul %2, %5, %cst {dimension_numbers = #tpu.dot_dimension_numbers<[1], [0], [0], [1], [0, 0, 1, 1], [], []>} : vector<8x16xbf16>, vector<16x512xbf16>, vector<8x512xf32> -> vector<8x512xf32>
    %c0_7 = arith.constant 0 : index
    %c0_8 = arith.constant 0 : index
    %7 = vector.load %arg4[%c0_7, %c0_8] : memref<8x512xbf16, #tpu.memory_space<vmem>>, vector<8x512xbf16>
    %cst_9 = arith.constant dense<0.000000e+00> : vector<8x512xf32>
    %8 = tpu.matmul %4, %7, %cst_9 {dimension_numbers = #tpu.dot_dimension_numbers<[1], [0], [0], [1], [0, 0, 1, 1], [], []>} : vector<8x8xbf16>, vector<8x512xbf16>, vector<8x512xf32> -> vector<8x512xf32>
    %9 = arith.addf %6, %8 : vector<8x512xf32>
    %10 = vector.extract_strided_slice %9 {offsets = [0, 0], sizes = [8, 256], strides = [1, 1]} : vector<8x512xf32> to vector<8x256xf32>
    %11 = vector.extract_strided_slice %0 {offsets = [0, 0], sizes = [1, 256], strides = [1, 1]} : vector<17x256xf32> to vector<1x256xf32>
    %12 = vector.broadcast %11 : vector<1x256xf32> to vector<8x256xf32>
    %13 = arith.addf %10, %12 : vector<8x256xf32>
    %14 = vector.extract_strided_slice %0 {offsets = [8, 0], sizes = [1, 256], strides = [1, 1]} : vector<17x256xf32> to vector<1x256xf32>
    %cst_10 = arith.constant 0.000000e+00 : f32
    %15 = vector.broadcast %cst_10 : f32 to vector<8x256xf32>
    %16 = arith.cmpf oge, %13, %15 : vector<8x256xf32>
    %17 = vector.broadcast %14 : vector<1x256xf32> to vector<8x256xf32>
    %18 = arith.mulf %17, %13 : vector<8x256xf32>
    %19 = arith.select %16, %13, %18 : vector<8x256xi1>, vector<8x256xf32>
    %20 = vector.extract_strided_slice %9 {offsets = [0, 256], sizes = [8, 256], strides = [1, 1]} : vector<8x512xf32> to vector<8x256xf32>
    %21 = vector.extract_strided_slice %0 {offsets = [1, 0], sizes = [1, 256], strides = [1, 1]} : vector<17x256xf32> to vector<1x256xf32>
    %22 = vector.broadcast %21 : vector<1x256xf32> to vector<8x256xf32>
    %23 = arith.addf %20, %22 : vector<8x256xf32>
    %24 = vector.extract_strided_slice %0 {offsets = [9, 0], sizes = [1, 256], strides = [1, 1]} : vector<17x256xf32> to vector<1x256xf32>
    %cst_11 = arith.constant 0.000000e+00 : f32
    %25 = vector.broadcast %cst_11 : f32 to vector<8x256xf32>
    %26 = arith.cmpf oge, %23, %25 : vector<8x256xf32>
    %27 = vector.broadcast %24 : vector<1x256xf32> to vector<8x256xf32>
    %28 = arith.mulf %27, %23 : vector<8x256xf32>
    %29 = arith.select %26, %23, %28 : vector<8x256xi1>, vector<8x256xf32>
    %c0_12 = arith.constant 0 : index
    %c0_13 = arith.constant 0 : index
    %c0_14 = arith.constant 0 : index
    %30 = vector.load %arg5[%c0_12, %c0_13, %c0_14] : memref<6x256x256xbf16, #tpu.memory_space<vmem>>, vector<1x256x256xbf16>
    %31 = vector.shape_cast %30 : vector<1x256x256xbf16> to vector<256x256xbf16>
    %32 = arith.truncf %19 : vector<8x256xf32> to vector<8x256xbf16>
    %cst_15 = arith.constant dense<0.000000e+00> : vector<8x256xf32>
    %33 = tpu.matmul %32, %31, %cst_15 {dimension_numbers = #tpu.dot_dimension_numbers<[1], [0], [0], [1], [0, 0, 1, 1], [], []>} : vector<8x256xbf16>, vector<256x256xbf16>, vector<8x256xf32> -> vector<8x256xf32>
    %34 = vector.extract_strided_slice %0 {offsets = [2, 0], sizes = [1, 256], strides = [1, 1]} : vector<17x256xf32> to vector<1x256xf32>
    %35 = vector.broadcast %34 : vector<1x256xf32> to vector<8x256xf32>
    %36 = arith.addf %33, %35 : vector<8x256xf32>
    %37 = vector.extract_strided_slice %0 {offsets = [10, 0], sizes = [1, 256], strides = [1, 1]} : vector<17x256xf32> to vector<1x256xf32>
    %cst_16 = arith.constant 0.000000e+00 : f32
    %38 = vector.broadcast %cst_16 : f32 to vector<8x256xf32>
    %39 = arith.cmpf oge, %36, %38 : vector<8x256xf32>
    %40 = vector.broadcast %37 : vector<1x256xf32> to vector<8x256xf32>
    %41 = arith.mulf %40, %36 : vector<8x256xf32>
    %42 = arith.select %39, %36, %41 : vector<8x256xi1>, vector<8x256xf32>
    %c1 = arith.constant 1 : index
    %c0_17 = arith.constant 0 : index
    %c0_18 = arith.constant 0 : index
    %43 = vector.load %arg5[%c1, %c0_17, %c0_18] : memref<6x256x256xbf16, #tpu.memory_space<vmem>>, vector<1x256x256xbf16>
    %44 = vector.shape_cast %43 : vector<1x256x256xbf16> to vector<256x256xbf16>
    %45 = arith.truncf %29 : vector<8x256xf32> to vector<8x256xbf16>
    %cst_19 = arith.constant dense<0.000000e+00> : vector<8x256xf32>
    %46 = tpu.matmul %45, %44, %cst_19 {dimension_numbers = #tpu.dot_dimension_numbers<[1], [0], [0], [1], [0, 0, 1, 1], [], []>} : vector<8x256xbf16>, vector<256x256xbf16>, vector<8x256xf32> -> vector<8x256xf32>
    %47 = vector.extract_strided_slice %0 {offsets = [3, 0], sizes = [1, 256], strides = [1, 1]} : vector<17x256xf32> to vector<1x256xf32>
    %48 = vector.broadcast %47 : vector<1x256xf32> to vector<8x256xf32>
    %49 = arith.addf %46, %48 : vector<8x256xf32>
    %50 = vector.extract_strided_slice %0 {offsets = [11, 0], sizes = [1, 256], strides = [1, 1]} : vector<17x256xf32> to vector<1x256xf32>
    %cst_20 = arith.constant 0.000000e+00 : f32
    %51 = vector.broadcast %cst_20 : f32 to vector<8x256xf32>
    %52 = arith.cmpf oge, %49, %51 : vector<8x256xf32>
    %53 = vector.broadcast %50 : vector<1x256xf32> to vector<8x256xf32>
    %54 = arith.mulf %53, %49 : vector<8x256xf32>
    %55 = arith.select %52, %49, %54 : vector<8x256xi1>, vector<8x256xf32>
    %c2 = arith.constant 2 : index
    %c0_21 = arith.constant 0 : index
    %c0_22 = arith.constant 0 : index
    %56 = vector.load %arg5[%c2, %c0_21, %c0_22] : memref<6x256x256xbf16, #tpu.memory_space<vmem>>, vector<1x256x256xbf16>
    %57 = vector.shape_cast %56 : vector<1x256x256xbf16> to vector<256x256xbf16>
    %58 = arith.truncf %42 : vector<8x256xf32> to vector<8x256xbf16>
    %cst_23 = arith.constant dense<0.000000e+00> : vector<8x256xf32>
    %59 = tpu.matmul %58, %57, %cst_23 {dimension_numbers = #tpu.dot_dimension_numbers<[1], [0], [0], [1], [0, 0, 1, 1], [], []>} : vector<8x256xbf16>, vector<256x256xbf16>, vector<8x256xf32> -> vector<8x256xf32>
    %60 = vector.extract_strided_slice %0 {offsets = [4, 0], sizes = [1, 256], strides = [1, 1]} : vector<17x256xf32> to vector<1x256xf32>
    %61 = vector.broadcast %60 : vector<1x256xf32> to vector<8x256xf32>
    %62 = arith.addf %59, %61 : vector<8x256xf32>
    %63 = vector.extract_strided_slice %0 {offsets = [12, 0], sizes = [1, 256], strides = [1, 1]} : vector<17x256xf32> to vector<1x256xf32>
    %cst_24 = arith.constant 0.000000e+00 : f32
    %64 = vector.broadcast %cst_24 : f32 to vector<8x256xf32>
    %65 = arith.cmpf oge, %62, %64 : vector<8x256xf32>
    %66 = vector.broadcast %63 : vector<1x256xf32> to vector<8x256xf32>
    %67 = arith.mulf %66, %62 : vector<8x256xf32>
    %68 = arith.select %65, %62, %67 : vector<8x256xi1>, vector<8x256xf32>
    %c3 = arith.constant 3 : index
    %c0_25 = arith.constant 0 : index
    %c0_26 = arith.constant 0 : index
    %69 = vector.load %arg5[%c3, %c0_25, %c0_26] : memref<6x256x256xbf16, #tpu.memory_space<vmem>>, vector<1x256x256xbf16>
    %70 = vector.shape_cast %69 : vector<1x256x256xbf16> to vector<256x256xbf16>
    %71 = arith.truncf %55 : vector<8x256xf32> to vector<8x256xbf16>
    %cst_27 = arith.constant dense<0.000000e+00> : vector<8x256xf32>
    %72 = tpu.matmul %71, %70, %cst_27 {dimension_numbers = #tpu.dot_dimension_numbers<[1], [0], [0], [1], [0, 0, 1, 1], [], []>} : vector<8x256xbf16>, vector<256x256xbf16>, vector<8x256xf32> -> vector<8x256xf32>
    %73 = vector.extract_strided_slice %0 {offsets = [5, 0], sizes = [1, 256], strides = [1, 1]} : vector<17x256xf32> to vector<1x256xf32>
    %74 = vector.broadcast %73 : vector<1x256xf32> to vector<8x256xf32>
    %75 = arith.addf %72, %74 : vector<8x256xf32>
    %76 = vector.extract_strided_slice %0 {offsets = [13, 0], sizes = [1, 256], strides = [1, 1]} : vector<17x256xf32> to vector<1x256xf32>
    %cst_28 = arith.constant 0.000000e+00 : f32
    %77 = vector.broadcast %cst_28 : f32 to vector<8x256xf32>
    %78 = arith.cmpf oge, %75, %77 : vector<8x256xf32>
    %79 = vector.broadcast %76 : vector<1x256xf32> to vector<8x256xf32>
    %80 = arith.mulf %79, %75 : vector<8x256xf32>
    %81 = arith.select %78, %75, %80 : vector<8x256xi1>, vector<8x256xf32>
    %c4 = arith.constant 4 : index
    %c0_29 = arith.constant 0 : index
    %c0_30 = arith.constant 0 : index
    %82 = vector.load %arg5[%c4, %c0_29, %c0_30] : memref<6x256x256xbf16, #tpu.memory_space<vmem>>, vector<1x256x256xbf16>
    %83 = vector.shape_cast %82 : vector<1x256x256xbf16> to vector<256x256xbf16>
    %84 = arith.truncf %68 : vector<8x256xf32> to vector<8x256xbf16>
    %cst_31 = arith.constant dense<0.000000e+00> : vector<8x256xf32>
    %85 = tpu.matmul %84, %83, %cst_31 {dimension_numbers = #tpu.dot_dimension_numbers<[1], [0], [0], [1], [0, 0, 1, 1], [], []>} : vector<8x256xbf16>, vector<256x256xbf16>, vector<8x256xf32> -> vector<8x256xf32>
    %86 = vector.extract_strided_slice %0 {offsets = [6, 0], sizes = [1, 256], strides = [1, 1]} : vector<17x256xf32> to vector<1x256xf32>
    %87 = vector.broadcast %86 : vector<1x256xf32> to vector<8x256xf32>
    %88 = arith.addf %85, %87 : vector<8x256xf32>
    %89 = vector.extract_strided_slice %0 {offsets = [14, 0], sizes = [1, 256], strides = [1, 1]} : vector<17x256xf32> to vector<1x256xf32>
    %cst_32 = arith.constant 0.000000e+00 : f32
    %90 = vector.broadcast %cst_32 : f32 to vector<8x256xf32>
    %91 = arith.cmpf oge, %88, %90 : vector<8x256xf32>
    %92 = vector.broadcast %89 : vector<1x256xf32> to vector<8x256xf32>
    %93 = arith.mulf %92, %88 : vector<8x256xf32>
    %94 = arith.select %91, %88, %93 : vector<8x256xi1>, vector<8x256xf32>
    %c5 = arith.constant 5 : index
    %c0_33 = arith.constant 0 : index
    %c0_34 = arith.constant 0 : index
    %95 = vector.load %arg5[%c5, %c0_33, %c0_34] : memref<6x256x256xbf16, #tpu.memory_space<vmem>>, vector<1x256x256xbf16>
    %96 = vector.shape_cast %95 : vector<1x256x256xbf16> to vector<256x256xbf16>
    %97 = arith.truncf %81 : vector<8x256xf32> to vector<8x256xbf16>
    %cst_35 = arith.constant dense<0.000000e+00> : vector<8x256xf32>
    %98 = tpu.matmul %97, %96, %cst_35 {dimension_numbers = #tpu.dot_dimension_numbers<[1], [0], [0], [1], [0, 0, 1, 1], [], []>} : vector<8x256xbf16>, vector<256x256xbf16>, vector<8x256xf32> -> vector<8x256xf32>
    %99 = vector.extract_strided_slice %0 {offsets = [7, 0], sizes = [1, 256], strides = [1, 1]} : vector<17x256xf32> to vector<1x256xf32>
    %100 = vector.broadcast %99 : vector<1x256xf32> to vector<8x256xf32>
    %101 = arith.addf %98, %100 : vector<8x256xf32>
    %102 = vector.extract_strided_slice %0 {offsets = [15, 0], sizes = [1, 256], strides = [1, 1]} : vector<17x256xf32> to vector<1x256xf32>
    %cst_36 = arith.constant 0.000000e+00 : f32
    %103 = vector.broadcast %cst_36 : f32 to vector<8x256xf32>
    %104 = arith.cmpf oge, %101, %103 : vector<8x256xf32>
    %105 = vector.broadcast %102 : vector<1x256xf32> to vector<8x256xf32>
    %106 = arith.mulf %105, %101 : vector<8x256xf32>
    %107 = arith.select %104, %101, %106 : vector<8x256xi1>, vector<8x256xf32>
    %108 = arith.truncf %94 : vector<8x256xf32> to vector<8x256xbf16>
    %c0_37 = arith.constant 0 : index
    %c0_38 = arith.constant 0 : index
    %c0_39 = arith.constant 0 : index
    %109 = vector.load %arg7[%c0_37, %c0_38, %c0_39] : memref<2x256x2xbf16, #tpu.memory_space<vmem>>, vector<1x256x2xbf16>
    %110 = vector.shape_cast %109 : vector<1x256x2xbf16> to vector<256x2xbf16>
    %cst_40 = arith.constant dense<0.000000e+00> : vector<8x2xf32>
    %111 = tpu.matmul %108, %110, %cst_40 {dimension_numbers = #tpu.dot_dimension_numbers<[1], [0], [0], [1], [0, 0, 1, 1], [], []>} : vector<8x256xbf16>, vector<256x2xbf16>, vector<8x2xf32> -> vector<8x2xf32>
    %112 = arith.truncf %107 : vector<8x256xf32> to vector<8x256xbf16>
    %c1_41 = arith.constant 1 : index
    %c0_42 = arith.constant 0 : index
    %c0_43 = arith.constant 0 : index
    %113 = vector.load %arg7[%c1_41, %c0_42, %c0_43] : memref<2x256x2xbf16, #tpu.memory_space<vmem>>, vector<1x256x2xbf16>
    %114 = vector.shape_cast %113 : vector<1x256x2xbf16> to vector<256x2xbf16>
    %cst_44 = arith.constant dense<0.000000e+00> : vector<8x2xf32>
    %115 = tpu.matmul %112, %114, %cst_44 {dimension_numbers = #tpu.dot_dimension_numbers<[1], [0], [0], [1], [0, 0, 1, 1], [], []>} : vector<8x256xbf16>, vector<256x2xbf16>, vector<8x2xf32> -> vector<8x2xf32>
    %116 = arith.addf %111, %115 : vector<8x2xf32>
    %117 = vector.extract_strided_slice %0 {offsets = [16, 0], sizes = [1, 2], strides = [1, 1]} : vector<17x256xf32> to vector<1x2xf32>
    %118 = vector.broadcast %117 : vector<1x2xf32> to vector<8x2xf32>
    %119 = arith.addf %116, %118 : vector<8x2xf32>
    %c0_45 = arith.constant 0 : index
    %c0_46 = arith.constant 0 : index
    %120 = vector.load %arg8[%c0_45, %c0_46] : memref<8x2xf32, #tpu.memory_space<vmem>>, vector<8x2xf32>
    tpu.vector_store %arg8[%c0_45, %c0_46], %119 {strides = array<i32>} : memref<8x2xf32, #tpu.memory_space<vmem>>, vector<8x2xf32>,
    return
  }
  func.func @transform_0(%arg0: i32) -> (i32, i32) {
    %c0_i32 = arith.constant 0 : i32
    %c0_i32_0 = arith.constant 0 : i32
    return %arg0, %c0_i32 : i32, i32
  }
  func.func @transform_1(%arg0: i32) -> (i32, i32) {
    %c0_i32 = arith.constant 0 : i32
    %c0_i32_0 = arith.constant 0 : i32
    return %arg0, %c0_i32 : i32, i32
  }
  func.func @transform_2(%arg0: i32) -> (i32, i32) {
    %c0_i32 = arith.constant 0 : i32
    %c0_i32_0 = arith.constant 0 : i32
    %c0_i32_1 = arith.constant 0 : i32
    return %c0_i32, %c0_i32_0 : i32, i32
  }
  func.func @transform_3(%arg0: i32) -> (i32, i32) {
    %c0_i32 = arith.constant 0 : i32
    %c0_i32_0 = arith.constant 0 : i32
    %c0_i32_1 = arith.constant 0 : i32
    return %c0_i32, %c0_i32_0 : i32, i32
  }
  func.func @transform_4(%arg0: i32) -> (i32, i32, i32) {
    %c0_i32 = arith.constant 0 : i32
    %c0_i32_0 = arith.constant 0 : i32
    %c0_i32_1 = arith.constant 0 : i32
    %c0_i32_2 = arith.constant 0 : i32
    return %c0_i32, %c0_i32_0, %c0_i32_1 : i32, i32, i32
  }
  func.func @transform_5(%arg0: i32) -> (i32, i32) {
    %c0_i32 = arith.constant 0 : i32
    %c0_i32_0 = arith.constant 0 : i32
    %c0_i32_1 = arith.constant 0 : i32
    return %c0_i32, %c0_i32_0 : i32, i32
  }
  func.func @transform_6(%arg0: i32) -> (i32, i32, i32) {
    %c0_i32 = arith.constant 0 : i32
    %c0_i32_0 = arith.constant 0 : i32
    %c0_i32_1 = arith.constant 0 : i32
    %c0_i32_2 = arith.constant 0 : i32
    return %c0_i32, %c0_i32_0, %c0_i32_1 : i32, i32, i32
  }
  func.func @transform_7(%arg0: i32) -> (i32, i32) {
    %c0_i32 = arith.constant 0 : i32
    %c0_i32_0 = arith.constant 0 : i32
    return %arg0, %c0_i32 : i32, i32
  }
}

</mosaic_0001>

<bundles_post_ra>
// kernel: critic_forward.1
= control target key start
LH: loop header
LB: loop body
LE: loop exit
PB: predicated region body
PF: predicated region fallthrough
CT: control target
= control target key end

     0   :  { %12 = vsyncpa [#allocation3], 0  ;;  %s2892_s24 = smov [#allocation2]   ;;  %s3136_s0 = inlined_call_operand.vmem [shape: f32[8,16], index: 0, kind: input, shape index: {}]   ;;  %s3137_s1 = inlined_call_operand.vmem [shape: f32[8,8], index: 1, kind: input, shape index: {}]   ;;  %s3138_s2 = inlined_call_operand.vmem [shape: bf16[16,512], index: 2, kind: input, shape index: {}]   ;;  %s3139_s3 = inlined_call_operand.vmem [shape: bf16[8,512], index: 3, kind: input, shape index: {}]   ;;  %s3140_s4 = inlined_call_operand.hbm [shape: bf16[6,256,256], index: 4, kind: input, shape index: {}]   ;;  %s3141_s5 = inlined_call_operand.vmem [shape: f32[17,256], index: 5, kind: input, shape index: {}]   ;;  %s3142_s6 = inlined_call_operand.vmem [shape: bf16[2,256,2], index: 6, kind: input, shape index: {}]   ;;  %s3143_s7 = inlined_call_operand.vmem [shape: f32[8,2], index: 7, kind: output, shape index: {}]  }
   0x1   :  { %s26_s25 = sshll.u32 %s2892_s24, 4  ;;  %s2868_s28 = scalar_lea.hbm %s3140_s4, 24576  ;;  %s27_s25 = int_to_ptr.vmem [resolvable:$true] %s26_s25 }
   0x2   :  { %p2869_p0 = scmp.ne.s32.totalorder %s3140_s4, %s2868_s28  ;;  %p2872_p1 = scmp.lt.u32.totalorder %s2868_s28, %s3140_s4 }
   0x4   :  { %p2874_p2 = pnand %p2872_p1, %p2869_p0 }
   0x6   :  { %2877 = shalt.err (!%p2874_p2)
}
   0x7   :  { %s2878_s10 = scalar_lea.vmem %s27_s25, 24576  ;;  %p2883_p4 = scmp.lt.s32.totalorder %s27_s25, %s27_s25 }
   0x8   :  { %p2879_p3 = scmp.ne.s32.totalorder %s27_s25, %s2878_s10  ;;  %p2884_p5 = scmp.lt.s32.totalorder %s2878_s10, %s2878_s10 }
   0xa   :  { %p2885_p6 = por %p2884_p5, %p2883_p4 }
   0xc   :  { %p2886_p7 = pnand %p2885_p6, %p2879_p3 }
   0xe   :  { %2889 = shalt.err (!%p2886_p7)
}
   0xf   :  { %s2893_s11 = smov 128   ;;  %s2894_s12 = smov 8  }
  0x10   :  { %32 = dma.hbm_to_vmem [thread:$0]  %s3140_s4, 24576, %s27_s25, [#allocation3], %s2893_s11, %s2893_s11, %s2894_s12  }
  0x11   :  { %2890 = dma.done.wait [#allocation3], 24576  }
  0x12   :  { %2891 = vsyncadd [#allocation3], 4294942720  ;;  %v2895_v0 = vmov 0   ;;  %v54_v1 = vld [vmem:[%s3139_s3] sm:$0xff]  ;;  %vm70_vm0 = vcmask 1043456   ;;  %v55_v2 = vld [vmem:[%s3139_s3 + $0x8] sm:$0xff] }
  0x13   :  { %115 = vmatprep.mubr.bf16.mxu0 %v2895_v0  ;;  %156 = vmatprep.mubr.bf16.mxu1 %v2895_v0  ;;  %v48_v3 = vld [vmem:[%s3137_s1] sm:$0xff]  ;;  %v2220_v4 = vcombine.high %v54_v1, %v54_v1  ;;  %v2222_v5 = vcombine.high %v55_v2, %v55_v2  ;;  %v2219_v6 = vcombine.low %v54_v1, %v54_v1  ;;  %v2547_v13 = vld [vmem:[%s3138_s2 + $0xc] ss:$16 sps:$4 sm:$0xff]   ;;  %vm66_vm1 = vcmask 64512   ;;  %v2545_v14 = vld [vmem:[%s3138_s2 + $0x8] ss:$16 sps:$4 sm:$0xff]  }
  0x14   :  { %v2221_v7 = vcombine.low %v55_v2, %v55_v2  ;;  %v2544_v8 = vld [vmem:[%s3138_s2 + $0x4] ss:$16 sps:$4 sm:$0xff]   ;;  %v49_v11 = vpack.c.bf16 %v48_v3, %v48_v3  ;;  %v2542_v12 = vld [vmem:[%s3138_s2] ss:$16 sps:$4 sm:$0xff]   ;;  %vm185_vm2 = vcmask 130048  }
  0x15   :  { %2223 = vmatprep.subr.msk.bf16.mxu0 %vm70_vm0, %v2220_v4  ;;  %2225 = vmatprep.subr.msk.bf16.mxu1 %vm70_vm0, %v2222_v5  ;;  %v72_v9 = vsel %vm70_vm0, %v2219_v6, 0  ;;  %v2550_v15 = vld [vmem:[#allocation2 + $0x4] ss:$8 sps:$4 sm:$0xff]   ;;  %v2548_v19 = vld [vmem:[#allocation2] ss:$8 sps:$4 sm:$0xff]  }
  0x16   :  { %v78_v10 = vsel %vm70_vm0, %v2221_v7, 0  ;;  %84 = vmatpush1.bf16.msra.mxu0 %v72_v9  ;;  %v2553_v16 = vld [vmem:[#allocation2 + $0x104] ss:$8 sps:$4 sm:$0xff]   ;;  %v2551_v20 = vld [vmem:[#allocation2 + $0x100] ss:$8 sps:$4 sm:$0xff]  }
  0x17   :  { %125 = vmatpush1.bf16.msra.mxu1 %v78_v10  ;;  %189 = vmatprep.subr.bf16.mxu0 %v2544_v8  ;;  %v46_v17 = vld [vmem:[%s3136_s0] sm:$0xff]  ;;  %v2556_v21 = vld [vmem:[#allocation2 + $0x14] ss:$8 sps:$4 sm:$0xff]   ;;  %v2554_v23 = vld [vmem:[#allocation2 + $0x10] ss:$8 sps:$4 sm:$0xff]  }
  0x18   :  { %230 = vmatprep.subr.bf16.mxu1 %v2547_v13  ;;  %v47_v18 = vpack.c.bf16 %v46_v17, %v46_v17  ;;  %v2559_v22 = vld [vmem:[#allocation2 + $0x114] ss:$8 sps:$4 sm:$0xff]   ;;  %v2557_v24 = vld [vmem:[#allocation2 + $0x110] ss:$8 sps:$4 sm:$0xff]   ;;  %v2562_v25 = vld [vmem:[#allocation2 + $0x24] ss:$8 sps:$4 sm:$0xff]  }
  0x19   :  { %2224 = vmatmul.mubr.msk.bf16.vlgmr.msra.gmra.mrb[0].mxu0 %vm66_vm1, %v49_v11  ;;  %v2565_v26 = vld [vmem:[#allocation2 + $0x124] ss:$8 sps:$4 sm:$0xff]   ;;  %v2560_v27 = vld [vmem:[#allocation2 + $0x20] ss:$8 sps:$4 sm:$0xff]   ;;  %v2568_v29 = vld [vmem:[#allocation2 + $0x34] ss:$8 sps:$4 sm:$0xff]  }
  0x1a   :  { %2226 = vmatmul.mubr.msk.bf16.vlgmr.msra.gmra.mrb[0].mxu1 %vm66_vm1, %v49_v11  ;;  %190 = vmatpush1.bf16.msra.mxu0 %v2542_v12  ;;  %v2563_v28 = vld [vmem:[#allocation2 + $0x120] ss:$8 sps:$4 sm:$0xff]   ;;  %v2571_v30 = vld [vmem:[#allocation2 + $0x134] ss:$8 sps:$4 sm:$0xff]   ;;  %v2566_v31 = vld [vmem:[#allocation2 + $0x30] ss:$8 sps:$4 sm:$0xff]  }
  0x1b   :  { %231 = vmatpush1.bf16.msra.mxu1 %v2545_v14  ;;  %221 = vmatprep.mubr.bf16.mxu0 %v2895_v0  ;;  %v2569_v32 = vld [vmem:[#allocation2 + $0x130] ss:$8 sps:$4 sm:$0xff]   ;;  %v2574_v33 = vld [vmem:[#allocation2 + $0x44] ss:$8 sps:$4 sm:$0xff]   ;;  %v2572_v35 = vld [vmem:[#allocation2 + $0x40] ss:$8 sps:$4 sm:$0xff]  }
  0x1c   :  { %262 = vmatprep.mubr.bf16.mxu1 %v2895_v0  ;;  %521 = vmatprep.subr.bf16.mxu0 %v2550_v15  ;;  %v2577_v34 = vld [vmem:[#allocation2 + $0x144] ss:$8 sps:$4 sm:$0xff]   ;;  %v2575_v36 = vld [vmem:[#allocation2 + $0x140] ss:$8 sps:$4 sm:$0xff]   ;;  %v2580_v37 = vld [vmem:[#allocation2 + $0x54] ss:$8 sps:$4 sm:$0xff]  }
  0x1d   :  { %779 = vmatprep.subr.bf16.mxu1 %v2553_v16  ;;  %v2583_v38 = vld [vmem:[#allocation2 + $0x154] ss:$8 sps:$4 sm:$0xff]   ;;  %v2578_v39 = vld [vmem:[#allocation2 + $0x50] ss:$8 sps:$4 sm:$0xff]   ;;  %v2586_v41 = vld [vmem:[#allocation2 + $0x64] ss:$8 sps:$4 sm:$0xff]  }
  0x1e   :  { %v2581_v40 = vld [vmem:[#allocation2 + $0x150] ss:$8 sps:$4 sm:$0xff]   ;;  %v2589_v42 = vld [vmem:[#allocation2 + $0x164] ss:$8 sps:$4 sm:$0xff]   ;;  %v2584_v43 = vld [vmem:[#allocation2 + $0x60] ss:$8 sps:$4 sm:$0xff]  }
  0x1f   :  { %v2587_v44 = vld [vmem:[#allocation2 + $0x160] ss:$8 sps:$4 sm:$0xff]   ;;  %v2592_v45 = vld [vmem:[#allocation2 + $0x74] ss:$8 sps:$4 sm:$0xff]   ;;  %v2590_v47 = vld [vmem:[#allocation2 + $0x70] ss:$8 sps:$4 sm:$0xff]  }
  0x20   :  { %v2595_v46 = vld [vmem:[#allocation2 + $0x174] ss:$8 sps:$4 sm:$0xff]   ;;  %v2593_v48 = vld [vmem:[#allocation2 + $0x170] ss:$8 sps:$4 sm:$0xff]   ;;  %v2598_v49 = vld [vmem:[#allocation2 + $0x84] ss:$8 sps:$4 sm:$0xff]  }
  0x21   :  { %2231 = vmatmul.mubr.msk.bf16.vlgmr.msra.gmra.mrb[4].mxu0 %vm185_vm2, %v47_v18  ;;  %v2601_v50 = vld [vmem:[#allocation2 + $0x184] ss:$8 sps:$4 sm:$0xff]   ;;  %v2596_v51 = vld [vmem:[#allocation2 + $0x80] ss:$8 sps:$4 sm:$0xff]   ;;  %v2604_v53 = vld [vmem:[#allocation2 + $0x94] ss:$8 sps:$4 sm:$0xff]  }
  0x22   :  { %2232 = vmatmul.mubr.msk.bf16.vlgmr.msra.gmra.mrb[4].mxu1 %vm185_vm2, %v47_v18  ;;  %522 = vmatpush1.bf16.msra.mxu0 %v2548_v19  ;;  %v2599_v52 = vld [vmem:[#allocation2 + $0x180] ss:$8 sps:$4 sm:$0xff]   ;;  %v2607_v54 = vld [vmem:[#allocation2 + $0x194] ss:$8 sps:$4 sm:$0xff]   ;;  %v2602_v55 = vld [vmem:[#allocation2 + $0x90] ss:$8 sps:$4 sm:$0xff]   ;;  %v271_v19 = vlaneseq }
  0x23   :  { %780 = vmatpush1.bf16.msra.mxu1 %v2551_v20  ;;  %523 = vmatprep.subr.bf16.mxu0 %v2556_v21  ;;  %v2605_v56 = vld [vmem:[#allocation2 + $0x190] ss:$8 sps:$4 sm:$0xff]   ;;  %v2610_v57 = vld [vmem:[#allocation2 + $0xa4] ss:$8 sps:$4 sm:$0xff]   ;;  %v2608_v59 = vld [vmem:[#allocation2 + $0xa0] ss:$8 sps:$4 sm:$0xff]  }
  0x24   :  { %781 = vmatprep.subr.bf16.mxu1 %v2559_v22  ;;  %v2613_v58 = vld [vmem:[#allocation2 + $0x1a4] ss:$8 sps:$4 sm:$0xff]   ;;  %v2611_v60 = vld [vmem:[#allocation2 + $0x1a0] ss:$8 sps:$4 sm:$0xff]   ;;  %v2616_v61 = vld [vmem:[#allocation2 + $0xb4] ss:$8 sps:$4 sm:$0xff]  }
  0x25   :  { %v2619_v62 = vld [vmem:[#allocation2 + $0x1b4] ss:$8 sps:$4 sm:$0xff]   ;;  %v2614_v63 = vld [vmem:[#allocation2 + $0xb0] ss:$8 sps:$4 sm:$0xff]   ;;  %v2622_v1 = vld [vmem:[#allocation2 + $0xc4] ss:$8 sps:$4 sm:$0xff]  }
  0x26   :  { %524 = vmatpush1.bf16.msra.mxu0 %v2554_v23  ;;  %v2617_v0 = vld [vmem:[#allocation2 + $0x1b0] ss:$8 sps:$4 sm:$0xff]   ;;  %v2625_v2 = vld [vmem:[#allocation2 + $0x1c4] ss:$8 sps:$4 sm:$0xff]   ;;  %v2620_v3 = vld [vmem:[#allocation2 + $0xc0] ss:$8 sps:$4 sm:$0xff]  }
  0x27   :  { %782 = vmatpush1.bf16.msra.mxu1 %v2557_v24  ;;  %525 = vmatprep.subr.bf16.mxu0 %v2562_v25  ;;  %v2623_v4 = vld [vmem:[#allocation2 + $0x1c0] ss:$8 sps:$4 sm:$0xff]   ;;  %v2628_v5 = vld [vmem:[#allocation2 + $0xd4] ss:$8 sps:$4 sm:$0xff]   ;;  %v2626_v7 = vld [vmem:[#allocation2 + $0xd0] ss:$8 sps:$4 sm:$0xff]  }
  0x28   :  { %783 = vmatprep.subr.bf16.mxu1 %v2565_v26  ;;  %v2631_v6 = vld [vmem:[#allocation2 + $0x1d4] ss:$8 sps:$4 sm:$0xff]   ;;  %v2629_v8 = vld [vmem:[#allocation2 + $0x1d0] ss:$8 sps:$4 sm:$0xff]   ;;  %v2634_v9 = vld [vmem:[#allocation2 + $0xe4] ss:$8 sps:$4 sm:$0xff]  }
  0x29   :  { %v2637_v10 = vld [vmem:[#allocation2 + $0x1e4] ss:$8 sps:$4 sm:$0xff]   ;;  %v2632_v11 = vld [vmem:[#allocation2 + $0xe0] ss:$8 sps:$4 sm:$0xff]   ;;  %v2640_v13 = vld [vmem:[#allocation2 + $0xf4] ss:$8 sps:$4 sm:$0xff]  }
  0x2a   :  { %526 = vmatpush1.bf16.msra.mxu0 %v2560_v27  ;;  %v2635_v12 = vld [vmem:[#allocation2 + $0x1e0] ss:$8 sps:$4 sm:$0xff]   ;;  %v2643_v14 = vld [vmem:[#allocation2 + $0x1f4] ss:$8 sps:$4 sm:$0xff]   ;;  %v2638_v15 = vld [vmem:[#allocation2 + $0xf0] ss:$8 sps:$4 sm:$0xff]  }
  0x2b   :  { %784 = vmatpush1.bf16.msra.mxu1 %v2563_v28  ;;  %527 = vmatprep.subr.bf16.mxu0 %v2568_v29  ;;  %v2641_v16 = vld [vmem:[#allocation2 + $0x1f0] ss:$8 sps:$4 sm:$0xff]   ;;  %v2646_v17 = vld [vmem:[#allocation2 + $0x204] ss:$8 sps:$4 sm:$0xff]   ;;  %v2972_v20 = vshrl.u32 %v271_v19, 7 }
  0x2c   :  { %785 = vmatprep.subr.bf16.mxu1 %v2571_v30  ;;  %v2649_v18 = vld [vmem:[#allocation2 + $0x304] ss:$8 sps:$4 sm:$0xff]   ;;  %v2662_v19 = vld [vmem:[#allocation2 + $0x230] ss:$8 sps:$4 sm:$0xff]  }
  0x2d   :  { %v273_v29 = vsub.s32 0, %v2972_v20  ;;  %v297_v30 = vsub.s32 1, %v2972_v20 }
  0x2e   :  { %528 = vmatpush1.bf16.msra.mxu0 %v2566_v31  ;;  %v2979_v31 = vld [vmem:[%s3141_s5] sm:$0xff] }
  0x2f   :  { %786 = vmatpush1.bf16.msra.mxu1 %v2569_v32  ;;  %529 = vmatprep.subr.bf16.mxu0 %v2574_v33  ;;  %v2984_v32 = vld [vmem:[%s3141_s5 + $0x8] sm:$0xff]  ;;  %v2989_v33 = vld [vmem:[%s3141_s5 + $0x10] sm:$0xff] }
  0x30   :  { %787 = vmatprep.subr.bf16.mxu1 %v2577_v34  ;;  %v274_v34 = vrot.slane %v2979_v31, %v273_v29 }
  0x32   :  { %530 = vmatpush1.bf16.msra.mxu0 %v2572_v35  ;;  %v298_v35 = vrot.slane %v2979_v31, %v297_v30 }
  0x33   :  { %788 = vmatpush1.bf16.msra.mxu1 %v2575_v36  ;;  %531 = vmatprep.subr.bf16.mxu0 %v2580_v37  ;;  %v2996_v36 = vld [vmem:[%s3141_s5 + $0x18] sm:$0xff] }
  0x34   :  { %789 = vmatprep.subr.bf16.mxu1 %v2583_v38 }
  0x36   :  { %532 = vmatpush1.bf16.msra.mxu0 %v2578_v39  ;;  %v278_v39 = vrot.slane %v2984_v32, %v273_v29 }
  0x37   :  { %790 = vmatpush1.bf16.msra.mxu1 %v2581_v40  ;;  %533 = vmatprep.subr.bf16.mxu0 %v2586_v41  ;;  %v302_v40 = vrot.slane %v2984_v32, %v297_v30 }
  0x38   :  { %791 = vmatprep.subr.bf16.mxu1 %v2589_v42  ;;  %v286_v42 = vrot.slane %v2989_v33, %v273_v29 }
  0x3a   :  { %534 = vmatpush1.bf16.msra.mxu0 %v2584_v43 }
  0x3b   :  { %792 = vmatpush1.bf16.msra.mxu1 %v2587_v44  ;;  %535 = vmatprep.subr.bf16.mxu0 %v2592_v45  ;;  %v310_v44 = vrot.slane %v2989_v33, %v297_v30 }
  0x3c   :  { %793 = vmatprep.subr.bf16.mxu1 %v2595_v46 }
  0x3e   :  { %536 = vmatpush1.bf16.msra.mxu0 %v2590_v47 }
  0x3f   :  { %794 = vmatpush1.bf16.msra.mxu1 %v2593_v48  ;;  %537 = vmatprep.subr.bf16.mxu0 %v2598_v49  ;;  %v290_v48 = vrot.slane %v2996_v36, %v273_v29  ;;  %v2677_v29 = vld [vmem:[#allocation2 + $0x350] ss:$8 sps:$4 sm:$0xff]  }
  0x40   :  { %795 = vmatprep.subr.bf16.mxu1 %v2601_v50  ;;  %v314_v50 = vrot.slane %v2996_v36, %v297_v30  ;;  %v2682_v30 = vld [vmem:[#allocation2 + $0x264] ss:$8 sps:$4 sm:$0xff]  }
  0x42   :  { %538 = vmatpush1.bf16.msra.mxu0 %v2596_v51 }
  0x43   :  { %796 = vmatpush1.bf16.msra.mxu1 %v2599_v52  ;;  %539 = vmatprep.subr.bf16.mxu0 %v2604_v53 }
  0x44   :  { %797 = vmatprep.subr.bf16.mxu1 %v2607_v54 }
  0x46   :  { %540 = vmatpush1.bf16.msra.mxu0 %v2602_v55 }
  0x47   :  { %798 = vmatpush1.bf16.msra.mxu1 %v2605_v56  ;;  %541 = vmatprep.subr.bf16.mxu0 %v2610_v57 }
  0x48   :  { %799 = vmatprep.subr.bf16.mxu1 %v2613_v58 }
  0x4a   :  { %542 = vmatpush1.bf16.msra.mxu0 %v2608_v59 }
  0x4b   :  { %800 = vmatpush1.bf16.msra.mxu1 %v2611_v60  ;;  %543 = vmatprep.subr.bf16.mxu0 %v2616_v61 }
  0x4c   :  { %801 = vmatprep.subr.bf16.mxu1 %v2619_v62 }
  0x4e   :  { %544 = vmatpush1.bf16.msra.mxu0 %v2614_v63 }
  0x4f   :  { %802 = vmatpush1.bf16.msra.mxu1 %v2617_v0  ;;  %545 = vmatprep.subr.bf16.mxu0 %v2622_v1 }
  0x50   :  { %803 = vmatprep.subr.bf16.mxu1 %v2625_v2 }
  0x52   :  { %546 = vmatpush1.bf16.msra.mxu0 %v2620_v3 }
  0x53   :  { %804 = vmatpush1.bf16.msra.mxu1 %v2623_v4  ;;  %547 = vmatprep.subr.bf16.mxu0 %v2628_v5  ;;  %v2644_v5 = vld [vmem:[#allocation2 + $0x200] ss:$8 sps:$4 sm:$0xff]  }
  0x54   :  { %805 = vmatprep.subr.bf16.mxu1 %v2631_v6  ;;  %v2647_v6 = vld [vmem:[#allocation2 + $0x300] ss:$8 sps:$4 sm:$0xff]  }
  0x56   :  { %548 = vmatpush1.bf16.msra.mxu0 %v2626_v7 }
  0x57   :  { %806 = vmatpush1.bf16.msra.mxu1 %v2629_v8  ;;  %549 = vmatprep.subr.bf16.mxu0 %v2634_v9  ;;  %v2652_v9 = vld [vmem:[#allocation2 + $0x214] ss:$8 sps:$4 sm:$0xff]  }
  0x58   :  { %807 = vmatprep.subr.bf16.mxu1 %v2637_v10  ;;  %v2655_v10 = vld [vmem:[#allocation2 + $0x314] ss:$8 sps:$4 sm:$0xff]  }
  0x5a   :  { %550 = vmatpush1.bf16.msra.mxu0 %v2632_v11  ;;  %v2650_v11 = vld [vmem:[#allocation2 + $0x210] ss:$8 sps:$4 sm:$0xff]  }
  0x5b   :  { %808 = vmatpush1.bf16.msra.mxu1 %v2635_v12  ;;  %551 = vmatprep.subr.bf16.mxu0 %v2640_v13  ;;  %v2653_v12 = vld [vmem:[#allocation2 + $0x310] ss:$8 sps:$4 sm:$0xff]   ;;  %v2658_v13 = vld [vmem:[#allocation2 + $0x224] ss:$8 sps:$4 sm:$0xff]  }
  0x5c   :  { %809 = vmatprep.subr.bf16.mxu1 %v2643_v14  ;;  %v2661_v14 = vld [vmem:[#allocation2 + $0x324] ss:$8 sps:$4 sm:$0xff]  }
  0x5e   :  { %552 = vmatpush1.bf16.msra.mxu0 %v2638_v15  ;;  %v2656_v15 = vld [vmem:[#allocation2 + $0x220] ss:$8 sps:$4 sm:$0xff]  }
  0x5f   :  { %810 = vmatpush1.bf16.msra.mxu1 %v2641_v16  ;;  %1037 = vmatprep.subr.bf16.mxu0 %v2646_v17  ;;  %v2659_v16 = vld [vmem:[#allocation2 + $0x320] ss:$8 sps:$4 sm:$0xff]   ;;  %v2664_v17 = vld [vmem:[#allocation2 + $0x234] ss:$8 sps:$4 sm:$0xff]  }
  0x60   :  { %1295 = vmatprep.subr.bf16.mxu1 %v2649_v18  ;;  %v2667_v18 = vld [vmem:[#allocation2 + $0x334] ss:$8 sps:$4 sm:$0xff]  }
  0xec   :  { %v117_v21 = vpop.f32.mrb[0].mxu0 }
  0xed   :  { %v158_v22 = vpop.f32.mrb[0].mxu1  ;;  %v119_v23 = vpop.f32.mrb[1].mxu0 }
  0xee   :  { %v160_v24 = vpop.f32.mrb[1].mxu1  ;;  %v121_v25 = vpop.f32.mrb[2].mxu0 }
  0xef   :  { %v162_v26 = vpop.f32.mrb[2].mxu1  ;;  %v122_v27 = vpop.f32.mrb[3].mxu0  ;;  %v2671_v25 = vld [vmem:[#allocation2 + $0x340] ss:$8 sps:$4 sm:$0xff]  }
  0xf0   :  { %v163_v28 = vpop.f32.mrb[3].mxu1  ;;  %v2676_v26 = vld [vmem:[#allocation2 + $0x254] ss:$8 sps:$4 sm:$0xff]  }
  0xf1   :  { %v2679_v27 = vld [vmem:[#allocation2 + $0x354] ss:$8 sps:$4 sm:$0xff]   ;;  %v2674_v28 = vld [vmem:[#allocation2 + $0x250] ss:$8 sps:$4 sm:$0xff]  }
  0xf4   :  { %v223_v37 = vpop.f32.mrb[4].mxu0 }
  0xf5   :  { %v264_v38 = vpop.f32.mrb[4].mxu1  ;;  %v224_v41 = vadd.f32 %v223_v37, %v117_v21  ;;  %v225_v45 = vpop.f32.mrb[5].mxu0  ;;  %v2665_v21 = vld [vmem:[#allocation2 + $0x330] ss:$8 sps:$4 sm:$0xff]   ;;  %v2683_v37 = vld [vmem:[#allocation2 + $0x360] ss:$8 sps:$4 sm:$0xff]  }
  0xf6   :  { %v265_v43 = vadd.f32 %v264_v38, %v158_v22  ;;  %v266_v46 = vpop.f32.mrb[5].mxu1  ;;  %v226_v47 = vadd.f32 %v225_v45, %v119_v23  ;;  %v227_v51 = vpop.f32.mrb[6].mxu0  ;;  %v2670_v22 = vld [vmem:[#allocation2 + $0x244] ss:$8 sps:$4 sm:$0xff]   ;;  %v2688_v38 = vld [vmem:[#allocation2 + $0x274] ss:$8 sps:$4 sm:$0xff]  }
  0xf7   :  { %v267_v49 = vadd.f32 %v266_v46, %v160_v24  ;;  %v268_v52 = vpop.f32.mrb[6].mxu1  ;;  %v279_v53 = vadd.f32 %v274_v34, %v224_v41  ;;  %v228_v55 = vpop.f32.mrb[7].mxu0  ;;  %v2673_v23 = vld [vmem:[#allocation2 + $0x344] ss:$8 sps:$4 sm:$0xff]   ;;  %v2668_v24 = vld [vmem:[#allocation2 + $0x240] ss:$8 sps:$4 sm:$0xff]  }
  0xf8   :  { %v303_v54 = vadd.f32 %v298_v35, %v265_v43  ;;  %v269_v56 = vpop.f32.mrb[7].mxu1  ;;  %v280_v57 = vadd.f32 %v278_v39, %v226_v47  ;;  %v2685_v34 = vld [vmem:[#allocation2 + $0x364] ss:$8 sps:$4 sm:$0xff]   ;;  %v2680_v35 = vld [vmem:[#allocation2 + $0x260] ss:$8 sps:$4 sm:$0xff]  }
  0xf9   :  { %v304_v58 = vadd.f32 %v302_v40, %v267_v49  ;;  %vm281_vm3 = vcmp.ge.f32.partialorder %v279_v53, 0.0  ;;  %v291_v59 = vmul.f32 %v286_v42, %v279_v53  ;;  %v2691_v39 = vld [vmem:[#allocation2 + $0x374] ss:$8 sps:$4 sm:$0xff]   ;;  %v2686_v40 = vld [vmem:[#allocation2 + $0x270] ss:$8 sps:$4 sm:$0xff]  }
  0xfa   :  { %vm305_vm4 = vcmp.ge.f32.partialorder %v303_v54, 0.0  ;;  %v315_v60 = vmul.f32 %v310_v44, %v303_v54  ;;  %v292_v61 = vmul.f32 %v290_v48, %v280_v57  ;;  %vm282_vm5 = vcmp.ge.f32.partialorder %v280_v57, 0.0  ;;  %v2689_v41 = vld [vmem:[#allocation2 + $0x370] ss:$8 sps:$4 sm:$0xff]   ;;  %v2694_v42 = vld [vmem:[#allocation2 + $0x284] ss:$8 sps:$4 sm:$0xff]  }
  0xfb   :  { %v316_v62 = vmul.f32 %v314_v50, %v304_v58  ;;  %vm306_vm6 = vcmp.ge.f32.partialorder %v304_v58, 0.0  ;;  %v293_v63 = vsel %vm281_vm3, %v279_v53, %v291_v59  ;;  %v2697_v43 = vld [vmem:[#allocation2 + $0x384] ss:$8 sps:$4 sm:$0xff]   ;;  %v2692_v44 = vld [vmem:[#allocation2 + $0x280] ss:$8 sps:$4 sm:$0xff]   ;;  %vm2212_vm3 = vcmask 15360  }
  0xfc   :  { %v317_v0 = vsel %vm305_vm4, %v303_v54, %v315_v60  ;;  %v294_v1 = vsel %vm282_vm5, %v280_v57, %v292_v61  ;;  %v351_v7 = vpack.c.bf16 %v293_v63, %v293_v63  ;;  %v2695_v45 = vld [vmem:[#allocation2 + $0x380] ss:$8 sps:$4 sm:$0xff]   ;;  %v2700_v46 = vld [vmem:[#allocation2 + $0x294] ss:$8 sps:$4 sm:$0xff]   ;;  %v2698_v48 = vld [vmem:[#allocation2 + $0x290] ss:$8 sps:$4 sm:$0xff]  }
  0xfd   :  { %v318_v2 = vsel %vm306_vm6, %v304_v58, %v316_v62  ;;  %v352_v3 = vpack.c.bf16 %v294_v1, %v294_v1  ;;  %v609_v8 = vpack.c.bf16 %v317_v0, %v317_v0  ;;  %v2703_v47 = vld [vmem:[#allocation2 + $0x394] ss:$8 sps:$4 sm:$0xff]   ;;  %v2701_v49 = vld [vmem:[#allocation2 + $0x390] ss:$8 sps:$4 sm:$0xff]   ;;  %v2706_v50 = vld [vmem:[#allocation2 + $0x2a4] ss:$8 sps:$4 sm:$0xff]  }
  0xfe   :  { %v610_v4 = vpack.c.bf16 %v318_v2, %v318_v2  ;;  %v2709_v51 = vld [vmem:[#allocation2 + $0x3a4] ss:$8 sps:$4 sm:$0xff]   ;;  %v2704_v52 = vld [vmem:[#allocation2 + $0x2a0] ss:$8 sps:$4 sm:$0xff]   ;;  %v2712_v54 = vld [vmem:[#allocation2 + $0x2b4] ss:$8 sps:$4 sm:$0xff]  }
  0xff   :  { %553 = vmatprep.mubr.bf16.mxu0 %v352_v3  ;;  %v2707_v53 = vld [vmem:[#allocation2 + $0x3a0] ss:$8 sps:$4 sm:$0xff]   ;;  %v2715_v55 = vld [vmem:[#allocation2 + $0x3b4] ss:$8 sps:$4 sm:$0xff]   ;;  %v2710_v56 = vld [vmem:[#allocation2 + $0x2b0] ss:$8 sps:$4 sm:$0xff]  }
 0x100   :  { %811 = vmatprep.mubr.bf16.mxu1 %v610_v4  ;;  %554 = vmatmul.mubr.bf16.vlgmr.msra.gmra.mrb[8].mxu0 %v351_v7  ;;  %v2713_v57 = vld [vmem:[#allocation2 + $0x3b0] ss:$8 sps:$4 sm:$0xff]   ;;  %v2718_v58 = vld [vmem:[#allocation2 + $0x2c4] ss:$8 sps:$4 sm:$0xff]   ;;  %v2716_v60 = vld [vmem:[#allocation2 + $0x2c0] ss:$8 sps:$4 sm:$0xff]  }
 0x101   :  { %812 = vmatmul.mubr.bf16.vlgmr.msra.gmra.mrb[8].mxu1 %v609_v8  ;;  %1038 = vmatpush1.bf16.msra.mxu0 %v2644_v5  ;;  %v2721_v59 = vld [vmem:[#allocation2 + $0x3c4] ss:$8 sps:$4 sm:$0xff]   ;;  %v2719_v61 = vld [vmem:[#allocation2 + $0x3c0] ss:$8 sps:$4 sm:$0xff]   ;;  %v2724_v62 = vld [vmem:[#allocation2 + $0x2d4] ss:$8 sps:$4 sm:$0xff]  }
 0x102   :  { %1296 = vmatpush1.bf16.msra.mxu1 %v2647_v6  ;;  %1039 = vmatprep.subr.bf16.mxu0 %v2652_v9  ;;  %v2727_v63 = vld [vmem:[#allocation2 + $0x3d4] ss:$8 sps:$4 sm:$0xff]   ;;  %v2722_v0 = vld [vmem:[#allocation2 + $0x2d0] ss:$8 sps:$4 sm:$0xff]   ;;  %v2730_v2 = vld [vmem:[#allocation2 + $0x2e4] ss:$8 sps:$4 sm:$0xff]  }
 0x103   :  { %1297 = vmatprep.subr.bf16.mxu1 %v2655_v10  ;;  %v2725_v1 = vld [vmem:[#allocation2 + $0x3d0] ss:$8 sps:$4 sm:$0xff]   ;;  %v2733_v3 = vld [vmem:[#allocation2 + $0x3e4] ss:$8 sps:$4 sm:$0xff]   ;;  %v2728_v4 = vld [vmem:[#allocation2 + $0x2e0] ss:$8 sps:$4 sm:$0xff]  }
 0x104   :  { %v2731_v5 = vld [vmem:[#allocation2 + $0x3e0] ss:$8 sps:$4 sm:$0xff]   ;;  %v2736_v6 = vld [vmem:[#allocation2 + $0x2f4] ss:$8 sps:$4 sm:$0xff]   ;;  %v2734_v8 = vld [vmem:[#allocation2 + $0x2f0] ss:$8 sps:$4 sm:$0xff]  }
 0x105   :  { %1040 = vmatpush1.bf16.msra.mxu0 %v2650_v11  ;;  %v2739_v7 = vld [vmem:[#allocation2 + $0x3f4] ss:$8 sps:$4 sm:$0xff]   ;;  %v2737_v9 = vld [vmem:[#allocation2 + $0x3f0] ss:$8 sps:$4 sm:$0xff]   ;;  %v2742_v10 = vld [vmem:[#allocation2 + $0x404] ss:$8 sps:$4 sm:$0xff]  }
 0x106   :  { %1298 = vmatpush1.bf16.msra.mxu1 %v2653_v12  ;;  %1041 = vmatprep.subr.bf16.mxu0 %v2658_v13  ;;  %v2745_v11 = vld [vmem:[#allocation2 + $0x504] ss:$8 sps:$4 sm:$0xff]   ;;  %v355_v12 = vsub.s32 2, %v2972_v20  ;;  %v613_v13 = vsub.s32 3, %v2972_v20 }
 0x107   :  { %1299 = vmatprep.subr.bf16.mxu1 %v2661_v14 }
 0x108   :  { %v356_v14 = vrot.slane %v2979_v31, %v355_v12 }
 0x109   :  { %1042 = vmatpush1.bf16.msra.mxu0 %v2656_v15  ;;  %v614_v15 = vrot.slane %v2979_v31, %v613_v13 }
 0x10a   :  { %1300 = vmatpush1.bf16.msra.mxu1 %v2659_v16  ;;  %1043 = vmatprep.subr.bf16.mxu0 %v2664_v17  ;;  %v360_v16 = vrot.slane %v2984_v32, %v355_v12  ;;  %v618_v17 = vrot.slane %v2984_v32, %v613_v13 }
 0x10b   :  { %1301 = vmatprep.subr.bf16.mxu1 %v2667_v18  ;;  %v567_v18 = vrot.slane %v2989_v33, %v355_v12 }
 0x10d   :  { %1044 = vmatpush1.bf16.msra.mxu0 %v2662_v19  ;;  %v825_v19 = vrot.slane %v2989_v33, %v613_v13 }
 0x10e   :  { %1302 = vmatpush1.bf16.msra.mxu1 %v2665_v21  ;;  %1045 = vmatprep.subr.bf16.mxu0 %v2670_v22 }
 0x10f   :  { %1303 = vmatprep.subr.bf16.mxu1 %v2673_v23  ;;  %v571_v23 = vrot.slane %v2996_v36, %v355_v12  ;;  %v2779_v12 = vld [vmem:[#allocation2 + $0x560] ss:$8 sps:$4 sm:$0xff]  }
 0x111   :  { %1046 = vmatpush1.bf16.msra.mxu0 %v2668_v24  ;;  %v829_v24 = vrot.slane %v2996_v36, %v613_v13  ;;  %v2784_v13 = vld [vmem:[#allocation2 + $0x474] ss:$8 sps:$4 sm:$0xff]  }
 0x112   :  { %1304 = vmatpush1.bf16.msra.mxu1 %v2671_v25  ;;  %1047 = vmatprep.subr.bf16.mxu0 %v2676_v26 }
 0x113   :  { %1305 = vmatprep.subr.bf16.mxu1 %v2679_v27 }
 0x115   :  { %1048 = vmatpush1.bf16.msra.mxu0 %v2674_v28 }
 0x116   :  { %1306 = vmatpush1.bf16.msra.mxu1 %v2677_v29  ;;  %1049 = vmatprep.subr.bf16.mxu0 %v2682_v30 }
 0x117   :  { %1307 = vmatprep.subr.bf16.mxu1 %v2685_v34 }
 0x119   :  { %1050 = vmatpush1.bf16.msra.mxu0 %v2680_v35 }
 0x11a   :  { %1308 = vmatpush1.bf16.msra.mxu1 %v2683_v37  ;;  %1051 = vmatprep.subr.bf16.mxu0 %v2688_v38 }
 0x11b   :  { %1309 = vmatprep.subr.bf16.mxu1 %v2691_v39 }
 0x11d   :  { %1052 = vmatpush1.bf16.msra.mxu0 %v2686_v40 }
 0x11e   :  { %1310 = vmatpush1.bf16.msra.mxu1 %v2689_v41  ;;  %1053 = vmatprep.subr.bf16.mxu0 %v2694_v42 }
 0x11f   :  { %1311 = vmatprep.subr.bf16.mxu1 %v2697_v43 }
 0x121   :  { %1054 = vmatpush1.bf16.msra.mxu0 %v2692_v44 }
 0x122   :  { %1312 = vmatpush1.bf16.msra.mxu1 %v2695_v45  ;;  %1055 = vmatprep.subr.bf16.mxu0 %v2700_v46 }
 0x123   :  { %1313 = vmatprep.subr.bf16.mxu1 %v2703_v47 }
 0x125   :  { %1056 = vmatpush1.bf16.msra.mxu0 %v2698_v48 }
 0x126   :  { %1314 = vmatpush1.bf16.msra.mxu1 %v2701_v49  ;;  %1057 = vmatprep.subr.bf16.mxu0 %v2706_v50  ;;  %v2740_v49 = vld [vmem:[#allocation2 + $0x400] ss:$8 sps:$4 sm:$0xff]  }
 0x127   :  { %1315 = vmatprep.subr.bf16.mxu1 %v2709_v51  ;;  %v2743_v50 = vld [vmem:[#allocation2 + $0x500] ss:$8 sps:$4 sm:$0xff]  }
 0x129   :  { %1058 = vmatpush1.bf16.msra.mxu0 %v2704_v52 }
 0x12a   :  { %1316 = vmatpush1.bf16.msra.mxu1 %v2707_v53  ;;  %1059 = vmatprep.subr.bf16.mxu0 %v2712_v54  ;;  %v2748_v53 = vld [vmem:[#allocation2 + $0x414] ss:$8 sps:$4 sm:$0xff]  }
 0x12b   :  { %1317 = vmatprep.subr.bf16.mxu1 %v2715_v55  ;;  %v2751_v54 = vld [vmem:[#allocation2 + $0x514] ss:$8 sps:$4 sm:$0xff]   ;;  %v2746_v55 = vld [vmem:[#allocation2 + $0x410] ss:$8 sps:$4 sm:$0xff]  }
 0x12d   :  { %1060 = vmatpush1.bf16.msra.mxu0 %v2710_v56  ;;  %v2749_v56 = vld [vmem:[#allocation2 + $0x510] ss:$8 sps:$4 sm:$0xff]  }
 0x12e   :  { %1318 = vmatpush1.bf16.msra.mxu1 %v2713_v57  ;;  %1061 = vmatprep.subr.bf16.mxu0 %v2718_v58  ;;  %v2754_v57 = vld [vmem:[#allocation2 + $0x424] ss:$8 sps:$4 sm:$0xff]  }
 0x12f   :  { %1319 = vmatprep.subr.bf16.mxu1 %v2721_v59  ;;  %v2757_v58 = vld [vmem:[#allocation2 + $0x524] ss:$8 sps:$4 sm:$0xff]   ;;  %v2752_v59 = vld [vmem:[#allocation2 + $0x420] ss:$8 sps:$4 sm:$0xff]  }
 0x131   :  { %1062 = vmatpush1.bf16.msra.mxu0 %v2716_v60  ;;  %v2755_v60 = vld [vmem:[#allocation2 + $0x520] ss:$8 sps:$4 sm:$0xff]  }
 0x132   :  { %1320 = vmatpush1.bf16.msra.mxu1 %v2719_v61  ;;  %1063 = vmatprep.subr.bf16.mxu0 %v2724_v62  ;;  %v2760_v61 = vld [vmem:[#allocation2 + $0x434] ss:$8 sps:$4 sm:$0xff]  }
 0x133   :  { %1321 = vmatprep.subr.bf16.mxu1 %v2727_v63  ;;  %v2763_v62 = vld [vmem:[#allocation2 + $0x534] ss:$8 sps:$4 sm:$0xff]   ;;  %v2758_v63 = vld [vmem:[#allocation2 + $0x430] ss:$8 sps:$4 sm:$0xff]  }
 0x135   :  { %1064 = vmatpush1.bf16.msra.mxu0 %v2722_v0  ;;  %v2761_v0 = vld [vmem:[#allocation2 + $0x530] ss:$8 sps:$4 sm:$0xff]  }
 0x136   :  { %1322 = vmatpush1.bf16.msra.mxu1 %v2725_v1  ;;  %1065 = vmatprep.subr.bf16.mxu0 %v2730_v2  ;;  %v2766_v1 = vld [vmem:[#allocation2 + $0x444] ss:$8 sps:$4 sm:$0xff]  }
 0x137   :  { %1323 = vmatprep.subr.bf16.mxu1 %v2733_v3  ;;  %v2769_v2 = vld [vmem:[#allocation2 + $0x544] ss:$8 sps:$4 sm:$0xff]   ;;  %v2764_v3 = vld [vmem:[#allocation2 + $0x440] ss:$8 sps:$4 sm:$0xff]  }
 0x139   :  { %1066 = vmatpush1.bf16.msra.mxu0 %v2728_v4  ;;  %v2767_v4 = vld [vmem:[#allocation2 + $0x540] ss:$8 sps:$4 sm:$0xff]  }
 0x13a   :  { %1324 = vmatpush1.bf16.msra.mxu1 %v2731_v5  ;;  %1067 = vmatprep.subr.bf16.mxu0 %v2736_v6  ;;  %v2772_v5 = vld [vmem:[#allocation2 + $0x454] ss:$8 sps:$4 sm:$0xff]  }
 0x13b   :  { %1325 = vmatprep.subr.bf16.mxu1 %v2739_v7  ;;  %v2775_v6 = vld [vmem:[#allocation2 + $0x554] ss:$8 sps:$4 sm:$0xff]   ;;  %v2770_v7 = vld [vmem:[#allocation2 + $0x450] ss:$8 sps:$4 sm:$0xff]  }
 0x13d   :  { %1068 = vmatpush1.bf16.msra.mxu0 %v2734_v8  ;;  %v2773_v8 = vld [vmem:[#allocation2 + $0x550] ss:$8 sps:$4 sm:$0xff]  }
 0x13e   :  { %1326 = vmatpush1.bf16.msra.mxu1 %v2737_v9  ;;  %1553 = vmatprep.subr.bf16.mxu0 %v2742_v10  ;;  %v2778_v9 = vld [vmem:[#allocation2 + $0x464] ss:$8 sps:$4 sm:$0xff]  }
 0x13f   :  { %1811 = vmatprep.subr.bf16.mxu1 %v2745_v11  ;;  %v2781_v10 = vld [vmem:[#allocation2 + $0x564] ss:$8 sps:$4 sm:$0xff]   ;;  %v2776_v11 = vld [vmem:[#allocation2 + $0x460] ss:$8 sps:$4 sm:$0xff]  }
 0x1d3   :  { %v555_v21 = vpop.f32.mrb[8].mxu0 }
 0x1d4   :  { %v813_v22 = vpop.f32.mrb[8].mxu1  ;;  %v556_v25 = vadd.f32 %v555_v21, %v356_v14  ;;  %v557_v27 = vpop.f32.mrb[9].mxu0  ;;  %v2787_v14 = vld [vmem:[#allocation2 + $0x574] ss:$8 sps:$4 sm:$0xff]   ;;  %v2791_v21 = vld [vmem:[#allocation2 + $0x580] ss:$8 sps:$4 sm:$0xff]  }
 0x1d5   :  { %v814_v26 = vadd.f32 %v813_v22, %v614_v15  ;;  %v815_v28 = vpop.f32.mrb[9].mxu1  ;;  %v558_v29 = vadd.f32 %v557_v27, %v360_v16  ;;  %v559_v34 = vpop.f32.mrb[10].mxu0  ;;  %v2782_v15 = vld [vmem:[#allocation2 + $0x470] ss:$8 sps:$4 sm:$0xff]   ;;  %v2796_v22 = vld [vmem:[#allocation2 + $0x494] ss:$8 sps:$4 sm:$0xff]  }
 0x1d6   :  { %v816_v30 = vadd.f32 %v815_v28, %v618_v17  ;;  %v817_v35 = vpop.f32.mrb[10].mxu1  ;;  %vm562_vm7 = vcmp.ge.f32.partialorder %v556_v25, 0.0  ;;  %v572_v37 = vmul.f32 %v567_v18, %v556_v25  ;;  %v560_v39 = vpop.f32.mrb[11].mxu0  ;;  %v2785_v16 = vld [vmem:[#allocation2 + $0x570] ss:$8 sps:$4 sm:$0xff]  }
 0x1d7   :  { %vm820_vm8 = vcmp.ge.f32.partialorder %v814_v26, 0.0  ;;  %v830_v38 = vmul.f32 %v825_v19, %v814_v26  ;;  %v818_v40 = vpop.f32.mrb[11].mxu1  ;;  %vm563_vm9 = vcmp.ge.f32.partialorder %v558_v29, 0.0  ;;  %v573_v41 = vmul.f32 %v571_v23, %v558_v29  ;;  %v2790_v17 = vld [vmem:[#allocation2 + $0x484] ss:$8 sps:$4 sm:$0xff]  }
 0x1d8   :  { %vm821_vm10 = vcmp.ge.f32.partialorder %v816_v30, 0.0  ;;  %v831_v42 = vmul.f32 %v829_v24, %v816_v30  ;;  %v574_v43 = vsel %vm562_vm7, %v556_v25, %v572_v37  ;;  %v2793_v18 = vld [vmem:[#allocation2 + $0x584] ss:$8 sps:$4 sm:$0xff]   ;;  %v2788_v19 = vld [vmem:[#allocation2 + $0x480] ss:$8 sps:$4 sm:$0xff]  }
 0x1d9   :  { %v832_v44 = vsel %vm820_vm8, %v814_v26, %v830_v38  ;;  %v575_v45 = vsel %vm563_vm9, %v558_v29, %v573_v41  ;;  %v867_v51 = vpack.c.bf16 %v574_v43, %v574_v43  ;;  %v2799_v23 = vld [vmem:[#allocation2 + $0x594] ss:$8 sps:$4 sm:$0xff]   ;;  %v2794_v24 = vld [vmem:[#allocation2 + $0x490] ss:$8 sps:$4 sm:$0xff]   ;;  %v2802_v26 = vld [vmem:[#allocation2 + $0x4a4] ss:$8 sps:$4 sm:$0xff]  }
 0x1da   :  { %v833_v46 = vsel %vm821_vm10, %v816_v30, %v831_v42  ;;  %v868_v47 = vpack.c.bf16 %v575_v45, %v575_v45  ;;  %v1125_v52 = vpack.c.bf16 %v832_v44, %v832_v44  ;;  %v2797_v25 = vld [vmem:[#allocation2 + $0x590] ss:$8 sps:$4 sm:$0xff]   ;;  %v2805_v27 = vld [vmem:[#allocation2 + $0x5a4] ss:$8 sps:$4 sm:$0xff]   ;;  %v2800_v28 = vld [vmem:[#allocation2 + $0x4a0] ss:$8 sps:$4 sm:$0xff]  }
 0x1db   :  { %v1126_v48 = vpack.c.bf16 %v833_v46, %v833_v46  ;;  %v2803_v29 = vld [vmem:[#allocation2 + $0x5a0] ss:$8 sps:$4 sm:$0xff]   ;;  %v2808_v30 = vld [vmem:[#allocation2 + $0x4b4] ss:$8 sps:$4 sm:$0xff]   ;;  %v2806_v35 = vld [vmem:[#allocation2 + $0x4b0] ss:$8 sps:$4 sm:$0xff]  }
 0x1dc   :  { %1069 = vmatprep.mubr.bf16.mxu0 %v868_v47  ;;  %v2811_v34 = vld [vmem:[#allocation2 + $0x5b4] ss:$8 sps:$4 sm:$0xff]   ;;  %v2809_v37 = vld [vmem:[#allocation2 + $0x5b0] ss:$8 sps:$4 sm:$0xff]   ;;  %v2814_v38 = vld [vmem:[#allocation2 + $0x4c4] ss:$8 sps:$4 sm:$0xff]  }
 0x1dd   :  { %1327 = vmatprep.mubr.bf16.mxu1 %v1126_v48  ;;  %1070 = vmatmul.mubr.bf16.vlgmr.msra.gmra.mrb[12].mxu0 %v867_v51  ;;  %v2817_v39 = vld [vmem:[#allocation2 + $0x5c4] ss:$8 sps:$4 sm:$0xff]   ;;  %v2812_v40 = vld [vmem:[#allocation2 + $0x4c0] ss:$8 sps:$4 sm:$0xff]   ;;  %v2820_v42 = vld [vmem:[#allocation2 + $0x4d4] ss:$8 sps:$4 sm:$0xff]  }
 0x1de   :  { %1328 = vmatmul.mubr.bf16.vlgmr.msra.gmra.mrb[12].mxu1 %v1125_v52  ;;  %1554 = vmatpush1.bf16.msra.mxu0 %v2740_v49  ;;  %v2815_v41 = vld [vmem:[#allocation2 + $0x5c0] ss:$8 sps:$4 sm:$0xff]   ;;  %v2823_v43 = vld [vmem:[#allocation2 + $0x5d4] ss:$8 sps:$4 sm:$0xff]   ;;  %v2818_v44 = vld [vmem:[#allocation2 + $0x4d0] ss:$8 sps:$4 sm:$0xff]  }
 0x1df   :  { %1812 = vmatpush1.bf16.msra.mxu1 %v2743_v50  ;;  %1555 = vmatprep.subr.bf16.mxu0 %v2748_v53  ;;  %v2821_v45 = vld [vmem:[#allocation2 + $0x5d0] ss:$8 sps:$4 sm:$0xff]   ;;  %v2826_v46 = vld [vmem:[#allocation2 + $0x4e4] ss:$8 sps:$4 sm:$0xff]   ;;  %v2824_v48 = vld [vmem:[#allocation2 + $0x4e0] ss:$8 sps:$4 sm:$0xff]  }
 0x1e0   :  { %1813 = vmatprep.subr.bf16.mxu1 %v2751_v54  ;;  %v2829_v47 = vld [vmem:[#allocation2 + $0x5e4] ss:$8 sps:$4 sm:$0xff]   ;;  %v2827_v49 = vld [vmem:[#allocation2 + $0x5e0] ss:$8 sps:$4 sm:$0xff]   ;;  %v2832_v50 = vld [vmem:[#allocation2 + $0x4f4] ss:$8 sps:$4 sm:$0xff]  }
 0x1e1   :  { %v2835_v51 = vld [vmem:[#allocation2 + $0x5f4] ss:$8 sps:$4 sm:$0xff]   ;;  %v2830_v52 = vld [vmem:[#allocation2 + $0x4f0] ss:$8 sps:$4 sm:$0xff]   ;;  %v2836_v54 = vld [vmem:[%s3142_s6 + $0xc0] sm:$0xff]  }
 0x1e2   :  { %1556 = vmatpush1.bf16.msra.mxu0 %v2746_v55  ;;  %v2833_v53 = vld [vmem:[#allocation2 + $0x5f0] ss:$8 sps:$4 sm:$0xff]   ;;  %v2837_v55 = vld [vmem:[%s3142_s6 + $0x40] sm:$0xff]  }
 0x1e3   :  { %1814 = vmatpush1.bf16.msra.mxu1 %v2749_v56  ;;  %1557 = vmatprep.subr.bf16.mxu0 %v2754_v57  ;;  %v871_v56 = vsub.s32 4, %v2972_v20  ;;  %v1129_v57 = vsub.s32 5, %v2972_v20 }
 0x1e4   :  { %1815 = vmatprep.subr.bf16.mxu1 %v2757_v58 }
 0x1e5   :  { %v872_v58 = vrot.slane %v2979_v31, %v871_v56 }
 0x1e6   :  { %1558 = vmatpush1.bf16.msra.mxu0 %v2752_v59  ;;  %v1130_v59 = vrot.slane %v2979_v31, %v1129_v57 }
 0x1e7   :  { %1816 = vmatpush1.bf16.msra.mxu1 %v2755_v60  ;;  %1559 = vmatprep.subr.bf16.mxu0 %v2760_v61  ;;  %v876_v60 = vrot.slane %v2984_v32, %v871_v56  ;;  %v1134_v61 = vrot.slane %v2984_v32, %v1129_v57 }
 0x1e8   :  { %1817 = vmatprep.subr.bf16.mxu1 %v2763_v62  ;;  %v1083_v62 = vrot.slane %v2989_v33, %v871_v56 }
 0x1ea   :  { %1560 = vmatpush1.bf16.msra.mxu0 %v2758_v63  ;;  %v1341_v63 = vrot.slane %v2989_v33, %v1129_v57 }
 0x1eb   :  { %1818 = vmatpush1.bf16.msra.mxu1 %v2761_v0  ;;  %1561 = vmatprep.subr.bf16.mxu0 %v2766_v1 }
 0x1ec   :  { %1819 = vmatprep.subr.bf16.mxu1 %v2769_v2  ;;  %v1087_v2 = vrot.slane %v2996_v36, %v871_v56  ;;  %v2863_v56 = vld [vmem:[%s3142_s6 + $0x30] sm:$0xff]  }
 0x1ee   :  { %1562 = vmatpush1.bf16.msra.mxu0 %v2764_v3  ;;  %v1345_v3 = vrot.slane %v2996_v36, %v1129_v57  ;;  %v2864_v57 = vld [vmem:[%s3142_s6 + $0xf8] sm:$0xff]  }
 0x1ef   :  { %1820 = vmatpush1.bf16.msra.mxu1 %v2767_v4  ;;  %1563 = vmatprep.subr.bf16.mxu0 %v2772_v5 }
 0x1f0   :  { %1821 = vmatprep.subr.bf16.mxu1 %v2775_v6 }
 0x1f2   :  { %1564 = vmatpush1.bf16.msra.mxu0 %v2770_v7 }
 0x1f3   :  { %1822 = vmatpush1.bf16.msra.mxu1 %v2773_v8  ;;  %1565 = vmatprep.subr.bf16.mxu0 %v2778_v9 }
 0x1f4   :  { %1823 = vmatprep.subr.bf16.mxu1 %v2781_v10 }
 0x1f6   :  { %1566 = vmatpush1.bf16.msra.mxu0 %v2776_v11 }
 0x1f7   :  { %1824 = vmatpush1.bf16.msra.mxu1 %v2779_v12  ;;  %1567 = vmatprep.subr.bf16.mxu0 %v2784_v13 }
 0x1f8   :  { %1825 = vmatprep.subr.bf16.mxu1 %v2787_v14 }
 0x1fa   :  { %1568 = vmatpush1.bf16.msra.mxu0 %v2782_v15 }
 0x1fb   :  { %1826 = vmatpush1.bf16.msra.mxu1 %v2785_v16  ;;  %1569 = vmatprep.subr.bf16.mxu0 %v2790_v17 }
 0x1fc   :  { %1827 = vmatprep.subr.bf16.mxu1 %v2793_v18 }
 0x1fe   :  { %1570 = vmatpush1.bf16.msra.mxu0 %v2788_v19 }
 0x1ff   :  { %1828 = vmatpush1.bf16.msra.mxu1 %v2791_v21  ;;  %1571 = vmatprep.subr.bf16.mxu0 %v2796_v22 }
 0x200   :  { %1829 = vmatprep.subr.bf16.mxu1 %v2799_v23 }
 0x202   :  { %1572 = vmatpush1.bf16.msra.mxu0 %v2794_v24 }
 0x203   :  { %1830 = vmatpush1.bf16.msra.mxu1 %v2797_v25  ;;  %1573 = vmatprep.subr.bf16.mxu0 %v2802_v26  ;;  %v2838_v25 = vld [vmem:[%s3142_s6 + $0x80] sm:$0xff]  }
 0x204   :  { %1831 = vmatprep.subr.bf16.mxu1 %v2805_v27  ;;  %v2839_v26 = vld [vmem:[%s3142_s6] sm:$0xff]  }
 0x206   :  { %1574 = vmatpush1.bf16.msra.mxu0 %v2800_v28 }
 0x207   :  { %1832 = vmatpush1.bf16.msra.mxu1 %v2803_v29  ;;  %1575 = vmatprep.subr.bf16.mxu0 %v2808_v30  ;;  %v2840_v29 = vld [vmem:[%s3142_s6 + $0xc8] sm:$0xff]  }
 0x208   :  { %1833 = vmatprep.subr.bf16.mxu1 %v2811_v34  ;;  %v2841_v30 = vld [vmem:[%s3142_s6 + $0x48] sm:$0xff]  }
 0x209   :  { %v2842_v34 = vld [vmem:[%s3142_s6 + $0x88] sm:$0xff]  }
 0x20a   :  { %1576 = vmatpush1.bf16.msra.mxu0 %v2806_v35  ;;  %v2843_v35 = vld [vmem:[%s3142_s6 + $0x8] sm:$0xff]  }
 0x20b   :  { %1834 = vmatpush1.bf16.msra.mxu1 %v2809_v37  ;;  %1577 = vmatprep.subr.bf16.mxu0 %v2814_v38  ;;  %v2844_v37 = vld [vmem:[%s3142_s6 + $0xd0] sm:$0xff]  }
 0x20c   :  { %1835 = vmatprep.subr.bf16.mxu1 %v2817_v39  ;;  %v2845_v38 = vld [vmem:[%s3142_s6 + $0x50] sm:$0xff]  }
 0x20d   :  { %v2846_v39 = vld [vmem:[%s3142_s6 + $0x90] sm:$0xff]  }
 0x20e   :  { %1578 = vmatpush1.bf16.msra.mxu0 %v2812_v40  ;;  %v2847_v40 = vld [vmem:[%s3142_s6 + $0x10] sm:$0xff]  }
 0x20f   :  { %1836 = vmatpush1.bf16.msra.mxu1 %v2815_v41  ;;  %1579 = vmatprep.subr.bf16.mxu0 %v2820_v42  ;;  %v2848_v41 = vld [vmem:[%s3142_s6 + $0xd8] sm:$0xff]  }
 0x210   :  { %1837 = vmatprep.subr.bf16.mxu1 %v2823_v43  ;;  %v2849_v42 = vld [vmem:[%s3142_s6 + $0x58] sm:$0xff]  }
 0x211   :  { %v2850_v43 = vld [vmem:[%s3142_s6 + $0x98] sm:$0xff]  }
 0x212   :  { %1580 = vmatpush1.bf16.msra.mxu0 %v2818_v44  ;;  %v2851_v44 = vld [vmem:[%s3142_s6 + $0x18] sm:$0xff]  }
 0x213   :  { %1838 = vmatpush1.bf16.msra.mxu1 %v2821_v45  ;;  %1581 = vmatprep.subr.bf16.mxu0 %v2826_v46  ;;  %v2852_v45 = vld [vmem:[%s3142_s6 + $0xe0] sm:$0xff]  }
 0x214   :  { %1839 = vmatprep.subr.bf16.mxu1 %v2829_v47  ;;  %v2853_v46 = vld [vmem:[%s3142_s6 + $0x60] sm:$0xff]  }
 0x215   :  { %v2854_v47 = vld [vmem:[%s3142_s6 + $0xa0] sm:$0xff]  }
 0x216   :  { %1582 = vmatpush1.bf16.msra.mxu0 %v2824_v48  ;;  %v2855_v48 = vld [vmem:[%s3142_s6 + $0x20] sm:$0xff]  }
 0x217   :  { %1840 = vmatpush1.bf16.msra.mxu1 %v2827_v49  ;;  %1583 = vmatprep.subr.bf16.mxu0 %v2832_v50  ;;  %v2856_v49 = vld [vmem:[%s3142_s6 + $0xe8] sm:$0xff]  }
 0x218   :  { %1841 = vmatprep.subr.bf16.mxu1 %v2835_v51  ;;  %v2857_v50 = vld [vmem:[%s3142_s6 + $0x68] sm:$0xff]  }
 0x219   :  { %v2858_v51 = vld [vmem:[%s3142_s6 + $0xa8] sm:$0xff]  }
 0x21a   :  { %1584 = vmatpush1.bf16.msra.mxu0 %v2830_v52  ;;  %v2859_v52 = vld [vmem:[%s3142_s6 + $0x28] sm:$0xff]  }
 0x21b   :  { %1842 = vmatpush1.bf16.msra.mxu1 %v2833_v53  ;;  %2490 = vmatprep.subr.bf16.mxu0 %v2836_v54  ;;  %v2860_v53 = vld [vmem:[%s3142_s6 + $0xf0] sm:$0xff]  }
 0x21c   :  { %2512 = vmatprep.subr.bf16.mxu1 %v2837_v55  ;;  %v2861_v54 = vld [vmem:[%s3142_s6 + $0x70] sm:$0xff]  }
 0x21d   :  { %v2862_v55 = vld [vmem:[%s3142_s6 + $0xb0] sm:$0xff]  }
 0x2b0   :  { %v1071_v0 = vpop.f32.mrb[12].mxu0 }
 0x2b1   :  { %v1329_v1 = vpop.f32.mrb[12].mxu1  ;;  %v1072_v4 = vadd.f32 %v1071_v0, %v872_v58  ;;  %v1073_v6 = vpop.f32.mrb[13].mxu0  ;;  %v2865_v58 = vld [vmem:[%s3142_s6 + $0x78] sm:$0xff]  }
 0x2b2   :  { %v1330_v5 = vadd.f32 %v1329_v1, %v1130_v59  ;;  %v1331_v7 = vpop.f32.mrb[13].mxu1  ;;  %v1074_v8 = vadd.f32 %v1073_v6, %v876_v60  ;;  %v1075_v10 = vpop.f32.mrb[14].mxu0  ;;  %v2866_v59 = vld [vmem:[%s3142_s6 + $0xb8] sm:$0xff]  }
 0x2b3   :  { %v1332_v9 = vadd.f32 %v1331_v7, %v1134_v61  ;;  %v1333_v11 = vpop.f32.mrb[14].mxu1  ;;  %vm1078_vm11 = vcmp.ge.f32.partialorder %v1072_v4, 0.0  ;;  %v1088_v12 = vmul.f32 %v1083_v62, %v1072_v4  ;;  %v1076_v14 = vpop.f32.mrb[15].mxu0  ;;  %v2867_v60 = vld [vmem:[%s3142_s6 + $0x38] sm:$0xff]   ;;  %v1387_v61 = vsub.s32 6, %v2972_v20 }
 0x2b4   :  { %vm1336_vm12 = vcmp.ge.f32.partialorder %v1330_v5, 0.0  ;;  %v1346_v13 = vmul.f32 %v1341_v63, %v1330_v5  ;;  %v1334_v15 = vpop.f32.mrb[15].mxu1  ;;  %vm1079_vm13 = vcmp.ge.f32.partialorder %v1074_v8, 0.0  ;;  %v1089_v16 = vmul.f32 %v1087_v2, %v1074_v8 }
 0x2b5   :  { %vm1337_vm14 = vcmp.ge.f32.partialorder %v1332_v9, 0.0  ;;  %v1347_v17 = vmul.f32 %v1345_v3, %v1332_v9  ;;  %v1090_v18 = vsel %vm1078_vm11, %v1072_v4, %v1088_v12  ;;  %v1645_v62 = vsub.s32 7, %v2972_v20 }
 0x2b6   :  { %v1348_v19 = vsel %vm1336_vm12, %v1330_v5, %v1346_v13  ;;  %v1091_v21 = vsel %vm1079_vm13, %v1074_v8, %v1089_v16  ;;  %v1383_v27 = vpack.c.bf16 %v1090_v18, %v1090_v18  ;;  %v1388_v63 = vrot.slane %v2979_v31, %v1387_v61 }
 0x2b7   :  { %v1349_v22 = vsel %vm1337_vm14, %v1332_v9, %v1347_v17  ;;  %v1384_v23 = vpack.c.bf16 %v1091_v21, %v1091_v21  ;;  %v1641_v28 = vpack.c.bf16 %v1348_v19, %v1348_v19  ;;  %v1646_v0 = vrot.slane %v2979_v31, %v1645_v62 }
 0x2b8   :  { %v1642_v24 = vpack.c.bf16 %v1349_v22, %v1349_v22  ;;  %v1392_v1 = vrot.slane %v2984_v32, %v1387_v61  ;;  %v1650_v2 = vrot.slane %v2984_v32, %v1645_v62  ;;  %v1599_v3 = vrot.slane %v2989_v33, %v1387_v61 }
 0x2b9   :  { %1585 = vmatprep.mubr.bf16.mxu0 %v1384_v23  ;;  %v1857_v4 = vrot.slane %v2989_v33, %v1645_v62  ;;  %v1603_v7 = vrot.slane %v2996_v36, %v1387_v61  ;;  %v1861_v8 = vrot.slane %v2996_v36, %v1645_v62 }
 0x2ba   :  { %1843 = vmatprep.mubr.bf16.mxu1 %v1642_v24  ;;  %1586 = vmatmul.mubr.bf16.vlgmr.msra.gmra.mrb[16].mxu0 %v1383_v27 }
 0x2bb   :  { %1844 = vmatmul.mubr.bf16.vlgmr.msra.gmra.mrb[16].mxu1 %v1641_v28  ;;  %2491 = vmatpush3.bf16.msra.mxu0 %v2838_v25 }
 0x2bc   :  { %2513 = vmatpush3.bf16.msra.mxu1 %v2839_v26  ;;  %2492 = vmatprep.subr.bf16.mxu0 %v2840_v29 }
 0x2bd   :  { %2514 = vmatprep.subr.bf16.mxu1 %v2841_v30 }
 0x2bf   :  { %2493 = vmatpush3.bf16.msra.mxu0 %v2842_v34 }
 0x2c0   :  { %2515 = vmatpush3.bf16.msra.mxu1 %v2843_v35  ;;  %2494 = vmatprep.subr.bf16.mxu0 %v2844_v37 }
 0x2c1   :  { %2516 = vmatprep.subr.bf16.mxu1 %v2845_v38 }
 0x2c3   :  { %2495 = vmatpush3.bf16.msra.mxu0 %v2846_v39  ;;  %v2489_v39 = vld [vmem:[%s3141_s5 + $0x20] ss:$0 sm:$0xff] }
 0x2c4   :  { %2517 = vmatpush3.bf16.msra.mxu1 %v2847_v40  ;;  %2496 = vmatprep.subr.bf16.mxu0 %v2848_v41 }
 0x2c5   :  { %2518 = vmatprep.subr.bf16.mxu1 %v2849_v42 }
 0x2c7   :  { %2497 = vmatpush3.bf16.msra.mxu0 %v2850_v43 }
 0x2c8   :  { %2519 = vmatpush3.bf16.msra.mxu1 %v2851_v44  ;;  %2498 = vmatprep.subr.bf16.mxu0 %v2852_v45 }
 0x2c9   :  { %2520 = vmatprep.subr.bf16.mxu1 %v2853_v46 }
 0x2cb   :  { %2499 = vmatpush3.bf16.msra.mxu0 %v2854_v47 }
 0x2cc   :  { %2521 = vmatpush3.bf16.msra.mxu1 %v2855_v48  ;;  %2500 = vmatprep.subr.bf16.mxu0 %v2856_v49 }
 0x2cd   :  { %2522 = vmatprep.subr.bf16.mxu1 %v2857_v50 }
 0x2cf   :  { %2501 = vmatpush3.bf16.msra.mxu0 %v2858_v51 }
 0x2d0   :  { %2523 = vmatpush3.bf16.msra.mxu1 %v2859_v52  ;;  %2502 = vmatprep.subr.bf16.mxu0 %v2860_v53 }
 0x2d1   :  { %2524 = vmatprep.subr.bf16.mxu1 %v2861_v54 }
 0x2d3   :  { %2503 = vmatpush3.bf16.msra.mxu0 %v2862_v55 }
 0x2d4   :  { %2525 = vmatpush3.bf16.msra.mxu1 %v2863_v56  ;;  %2504 = vmatprep.subr.bf16.mxu0 %v2864_v57 }
 0x2d5   :  { %2526 = vmatprep.subr.bf16.mxu1 %v2865_v58 }
 0x2d7   :  { %2505 = vmatpush3.bf16.msra.mxu0 %v2866_v59 }
 0x2d8   :  { %2527 = vmatpush3.bf16.msra.mxu1 %v2867_v60 }
 0x38d   :  { %v1587_v5 = vpop.f32.mrb[16].mxu0 }
 0x38e   :  { %v1845_v6 = vpop.f32.mrb[16].mxu1  ;;  %v1588_v9 = vadd.f32 %v1587_v5, %v1388_v63  ;;  %v1589_v10 = vpop.f32.mrb[17].mxu0 }
 0x38f   :  { %v1846_v20 = vadd.f32 %v1845_v6, %v1646_v0  ;;  %v1847_v11 = vpop.f32.mrb[17].mxu1  ;;  %v1590_v12 = vadd.f32 %v1589_v10, %v1392_v1  ;;  %v1591_v13 = vpop.f32.mrb[18].mxu0 }
 0x390   :  { %v1848_v31 = vadd.f32 %v1847_v11, %v1650_v2  ;;  %v1849_v14 = vpop.f32.mrb[18].mxu1  ;;  %vm1594_vm15 = vcmp.ge.f32.partialorder %v1588_v9, 0.0  ;;  %v1604_v32 = vmul.f32 %v1599_v3, %v1588_v9  ;;  %v1592_v16 = vpop.f32.mrb[19].mxu0 }
 0x391   :  { %vm1852_vm0 = vcmp.ge.f32.partialorder %v1846_v20, 0.0  ;;  %v1862_v15 = vmul.f32 %v1857_v4, %v1846_v20  ;;  %v1850_v33 = vpop.f32.mrb[19].mxu1  ;;  %vm1595_vm1 = vcmp.ge.f32.partialorder %v1590_v12, 0.0  ;;  %v1605_v17 = vmul.f32 %v1603_v7, %v1590_v12 }
 0x392   :  { %vm1853_vm2 = vcmp.ge.f32.partialorder %v1848_v31, 0.0  ;;  %v1863_v18 = vmul.f32 %v1861_v8, %v1848_v31  ;;  %v1606_v19 = vsel %vm1594_vm15, %v1588_v9, %v1604_v32 }
 0x393   :  { %v1864_v36 = vsel %vm1852_vm0, %v1846_v20, %v1862_v15  ;;  %v1607_v22 = vsel %vm1595_vm1, %v1590_v12, %v1605_v17  ;;  %v1866_v25 = vpack.c.bf16 %v1606_v19, %v1606_v19 }
 0x394   :  { %v1865_v21 = vsel %vm1853_vm2, %v1848_v31, %v1863_v18  ;;  %v1867_v24 = vpack.c.bf16 %v1607_v22, %v1607_v22  ;;  %v1900_v26 = vpack.c.bf16 %v1864_v36, %v1864_v36 }
 0x395   :  { %v1901_v23 = vpack.c.bf16 %v1865_v21, %v1865_v21 }
 0x396   :  { %2199 = vmatprep.mubr.bf16.mxu1 %v1867_v24 }
 0x397   :  { %2063 = vmatprep.mubr.bf16.mxu0 %v1901_v23  ;;  %2200 = vmatmul.mubr.bf16.vlgmr.msra.gmra.mrb[20].mxu1 %v1866_v25 }
 0x398   :  { %2064 = vmatmul.mubr.bf16.vlgmr.msra.gmra.mrb[20].mxu0 %v1900_v26 }
 0x46a   :  { %v2528_v28 = vpop.f32.mrb[20].mxu1 }
 0x46b   :  { %v2506_v27 = vpop.f32.mrb[20].mxu0  ;;  %v2529_v30 = vpop.f32.mrb[21].mxu1 }
 0x46c   :  { %v2507_v29 = vpop.f32.mrb[21].mxu0  ;;  %v2530_v35 = vadd.f32 %v2529_v30, %v2528_v28  ;;  %v2531_v38 = vpop.f32.mrb[22].mxu1 }
 0x46d   :  { %v2508_v34 = vadd.f32 %v2507_v29, %v2506_v27  ;;  %v2509_v37 = vpop.f32.mrb[22].mxu0  ;;  %v2532_v41 = vpop.f32.mrb[23].mxu1 }
 0x46e   :  { %v2510_v40 = vpop.f32.mrb[23].mxu0 }
 0x46f   :  { %v2202_v42 = vadd.f32 %v2530_v35, %v2508_v34 }
 0x471   :  { %v2211_v43 = vadd.f32 %v2489_v39, %v2202_v42 }
 0x473   :  { %2213 = vst.msk [vmem:[%s3143_s7] sm:$0xff] %vm2212_vm3, %v2211_v43 }
 0x474   :  { %2218 = vsyncpa [#allocation3], 1 }

</bundles_post_ra>
